<compile_context>
chip_gen: v7x
topology: tpu7x:2x2x1
jax: 0.10.0
libtpu: 0.0.40
codegen_flags: <defaults>
</compile_context>

<pallas_src>
import math
import functools

import jax
import jax.numpy as jnp
import numpy as np
from jax.experimental import pallas as pl
from jax.experimental.pallas import tpu as pltpu


# ----------------------------- in-kernel helpers ----------------------------------

def _layernorm(x, a, b, eps=1e-6, approx=True):
    # PyTorch ref: a * (x - mean) / (std + eps) + b, std = unbiased std over last dim
    mean = jnp.mean(x, axis=-1, keepdims=True)
    var = jnp.sum((x - mean) ** 2, axis=-1, keepdims=True) / (x.shape[-1] - 1)
    denom = jnp.sqrt(var) + eps
    inv = pl.reciprocal(denom, approx=True) if approx else 1.0 / denom
    return a * (x - mean) * inv + b


def _gelu(x):
    return 0.5 * x * (1.0 + jnp.tanh(math.sqrt(2.0 / math.pi) * (x + 0.044715 * x ** 3)))


# ----------------------------------- kernel ---------------------------------------

def transformer_block_kernel(len_ref, x_ref,
                             wqkv_ref, bqkv_ref, wo_ref, bo_ref, ln1a_ref, ln1b_ref,
                             w1_ref, b1_ref, w2_ref, b2_ref, ln2a_ref, ln2b_ref,
                             o_ref,
                             x1_ref, xn2_ref, acc_ref,
                             *, n_heads, d_k, dkp, block_b, seq_len, approx_recip):
    f32 = jnp.float32
    mxu_dt = wqkv_ref.dtype
    R, H = x_ref.shape                      # R = block_b * seq_len rows, H = hidden
    scale = 1.0 / math.sqrt(d_k)
    fi = pl.program_id(1)                   # d_ff chunk index (inner, "arbitrary" axis)

    # ------- attention sublayer + LN2: only on the first d_ff chunk of each block ----
    @pl.when(fi == 0)
    def _attention_and_ln2():
        x = x_ref[...].astype(f32)          # bf16 at the boundary, f32 math in-kernel

        # Additive mask bias from the per-query valid length (replaces the (S,S) f32
        # input): bias[q, k] = 0 if k < traj_len[q] else -1e9.
        col = jax.lax.broadcasted_iota(jnp.int32, (seq_len, seq_len), 1)
        bias = jnp.where(col < len_ref[...], 0.0, -1e9).astype(f32)     # (S, S)

        xn = _layernorm(x, ln1a_ref[...], ln1b_ref[...], approx=approx_recip)
        # Fused QKV matmul; single f32->bf16 cast of the whole slab (head slices below
        # are 128-lane aligned thanks to the head-major padded weight layout).
        qkv = (jnp.dot(xn.astype(mxu_dt), wqkv_ref[...],
                       preferred_element_type=f32) + bqkv_ref[...]).astype(mxu_dt)

        attn = jnp.zeros((R, H), f32)
        # TODO(synk): for large n_heads switch to lax.fori_loop(..., unroll=2) over a
        # qkv VMEM scratch to bound vreg live ranges (review item); n_heads is small here.
        for h in range(n_heads):
            base = 3 * h * dkp                                   # 128-aligned offsets
            qh = qkv[:, base           : base + dkp    ].reshape(block_b, seq_len, dkp)
            kh = qkv[:, base + dkp     : base + 2 * dkp].reshape(block_b, seq_len, dkp)
            vh = qkv[:, base + 2 * dkp : base + 3 * dkp].reshape(block_b, seq_len, dkp)

            s = jnp.einsum("bqd,bkd->bqk", qh, kh,
                           preferred_element_type=f32) * scale           # (Bt, S, S)
            s = s + bias[None, :, :]
            s = s - jnp.max(s, axis=-1, keepdims=True)
            p = jnp.exp(s)
            denom = jnp.sum(p, axis=-1, keepdims=True)
            p = p * (pl.reciprocal(denom, approx=True) if approx_recip else 1.0 / denom)

            ctx = jnp.einsum("bqk,bkd->bqd", p.astype(mxu_dt), vh,
                             preferred_element_type=f32)                 # (Bt, S, dkp)
            # Fold the output projection per head: no ctx scratch, no masked stores.
            attn = attn + jnp.dot(ctx.reshape(R, dkp).astype(mxu_dt), wo_ref[h],
                                  preferred_element_type=f32)

        x1 = x + attn + bo_ref[...]                              # residual (dropout=id)
        x1_ref[...] = x1
        xn2_ref[...] = _layernorm(x1, ln2a_ref[...], ln2b_ref[...],
                                  approx=approx_recip).astype(xn2_ref.dtype)
        acc_ref[...] = jnp.zeros_like(acc_ref)

    # ------------------- FFN, streamed over d_ff chunks (every step) -----------------
    h1 = _gelu(jnp.dot(xn2_ref[...], w1_ref[...],
                       preferred_element_type=f32) + b1_ref[...])        # (R, tile_ff)
    acc_ref[...] += jnp.dot(h1.astype(mxu_dt), w2_ref[...],
                            preferred_element_type=f32)                  # (R, H)

    @pl.when(fi == pl.num_programs(1) - 1)
    def _finalize():
        o_ref[...] = (x1_ref[...] + acc_ref[...] + b2_ref[...]).astype(o_ref.dtype)


# ----------------------------------- wrapper ---------------------------------------

def _pick_tile_ff(d_ff, max_tile=512):
    if d_ff <= max_tile:
        return d_ff
    t = max_tile - (max_tile % 128)
    while t >= 128:
        if d_ff % t == 0:
            return t
        t -= 128
    return d_ff


def _pick_block_b(B, S, per_row_bytes, budget_bytes, min_steps=4):
    cap = max(1, budget_bytes // max(1, per_row_bytes * S))   # batch elems / step by VMEM
    best = 1
    for bb in range(1, B + 1):
        if B % bb == 0 and bb <= cap and B // bb >= min(min_steps, B):
            best = bb
    return best


def transformer_block(x, traj_len, params, n_heads, *, block_b=None, tile_ff=None,
                      mxu_dtype=jnp.bfloat16, io_dtype=jnp.bfloat16,
                      approx_recip=True, act_vmem_budget=16 * 2 ** 20):
    B, S, H = x.shape
    assert H % n_heads == 0
    d_k = H // n_heads
    dkp = ((d_k + 127) // 128) * 128          # per-head width padded to a lane tile
    d_ff = params["w1"].shape[0]
    f32 = jnp.float32

    # The reference mask broadcast (mask.sum(-1): (B,S) vs scores (B,h,S,S)) requires
    # B == S or B == 1; the query axis is indexed by the mask's batch axis.
    if B == S:
        Lrow = jnp.asarray(traj_len, jnp.int32)
    elif B == 1:
        Lrow = jnp.full((S,), jnp.asarray(traj_len, jnp.int32)[0], jnp.int32)
    else:
        raise ValueError("TransformerBlock mask semantics require batch == seq (or batch == 1).")
    len2d = Lrow.reshape(S, 1)

    # ---- FFN streaming tile and VMEM-budgeted batch block ----
    if tile_ff is None:
        tile_ff = _pick_tile_ff(d_ff)
    assert d_ff % tile_ff == 0
    n_ff = d_ff // tile_ff

    if block_b is None:
        per_row = 4 * (3 * n_heads * dkp) + 4 * tile_ff + 26 * H   # rough live f32 bytes/row
        block_b = _pick_block_b(B, S, per_row, act_vmem_budget)
    assert B % block_b == 0
    rows = block_b * S
    grid = (B // block_b, n_ff)

    # ---- head-major, lane-padded fused QKV weight (kernel computes x @ W directly) ----
    wcols, bcols = [], []
    for h in range(n_heads):
        for w_, b_ in ((params["wq"], params["bq"]),
                       (params["wk"], params["bk"]),
                       (params["wv"], params["bv"])):
            blkw = jnp.zeros((H, dkp), f32).at[:, :d_k].set(
                jnp.asarray(w_, f32)[h * d_k:(h + 1) * d_k, :].T)
            blkb = jnp.zeros((dkp,), f32).at[:d_k].set(
                jnp.asarray(b_, f32)[h * d_k:(h + 1) * d_k])
            wcols.append(blkw)
            bcols.append(blkb)
    wqkv = jnp.concatenate(wcols, axis=1).astype(mxu_dtype)       # (H, 3*n_heads*dkp)
    bqkv = jnp.concatenate(bcols)[None, :].astype(f32)            # (1, 3*n_heads*dkp)

    # Output projection split per head with zero-padded rows: (n_heads, dkp, H).
    wo3 = jnp.stack(
        [jnp.zeros((dkp, H), f32).at[:d_k, :].set(
            jnp.asarray(params["wo"], f32)[:, h * d_k:(h + 1) * d_k].T)
         for h in range(n_heads)], axis=0).astype(mxu_dtype)

    r2 = lambda v: jnp.asarray(v, f32).reshape(1, -1)
    w1t = jnp.asarray(params["w1"], f32).T.astype(mxu_dtype)      # (H, d_ff)
    w2t = jnp.asarray(params["w2"], f32).T.astype(mxu_dtype)      # (d_ff, H)
    b12, b22 = r2(params["b1"]), r2(params["b2"])
    bo2 = r2(params["bo"])
    ln1a2, ln1b2 = r2(params["ln1_a"]), r2(params["ln1_b"])
    ln2a2, ln2b2 = r2(params["ln2_a"]), r2(params["ln2_b"])

    x2d = x.reshape(B * S, H).astype(io_dtype)                    # bf16 at the boundary

    # ---- BlockSpecs (grid = (batch blocks, d_ff chunks)) ----
    def const_spec(shape):
        # Constant-index weight/bias block (re-DMA skipped when the index is unchanged).
        # On VMEM-tight chips these could be single-buffered with pipeline_mode=pl.Buffered(1).
        return pl.BlockSpec(shape, lambda i, f: (0,) * len(shape))

    in_specs = [
        const_spec((S, 1)),                                   # per-query lengths
        pl.BlockSpec((rows, H), lambda i, f: (i, 0)),         # x rows
        const_spec((H, 3 * n_heads * dkp)),                   # fused QKV weight
        const_spec((1, 3 * n_heads * dkp)),                   # fused QKV bias
        const_spec((n_heads, dkp, H)),                        # per-head output proj
        const_spec((1, H)),                                   # bo
        const_spec((1, H)), const_spec((1, H)),               # ln1 a / b
        pl.BlockSpec((H, tile_ff), lambda i, f: (0, f)),      # w1 column chunk
        pl.BlockSpec((1, tile_ff), lambda i, f: (0, f)),      # b1 chunk
        pl.BlockSpec((tile_ff, H), lambda i, f: (f, 0)),      # w2 row chunk
        const_spec((1, H)),                                   # b2
        const_spec((1, H)), const_spec((1, H)),               # ln2 a / b
    ]
    out_spec = pl.BlockSpec((rows, H), lambda i, f: (i, 0))

    scratch_shapes = [
        pltpu.VMEM((rows, H), jnp.float32),                   # x1 (residual)
        pltpu.VMEM((rows, H), mxu_dtype),                     # LN2(x1), MXU-ready
        pltpu.VMEM((rows, H), jnp.float32),                   # FFN accumulator
    ]

    # ---- explicit VMEM limit computed from actual block / weight / scratch sizes ----
    nbytes = lambda a: int(a.size) * jnp.dtype(a.dtype).itemsize
    const_bytes = 2 * sum(nbytes(a) for a in
                          (len2d, wqkv, bqkv, wo3, bo2, ln1a2, ln1b2, b22, ln2a2, ln2b2))
    stream_bytes = 2 * (H * tile_ff + tile_ff * H) * jnp.dtype(mxu_dtype).itemsize \
                   + 2 * tile_ff * 4
    io_bytes = 2 * 2 * rows * H * jnp.dtype(io_dtype).itemsize
    scratch_bytes = rows * H * (4 + jnp.dtype(mxu_dtype).itemsize + 4)
    act_bytes = rows * (3 * n_heads * dkp * 4 + tile_ff * 4 + 6 * H * 4)
    est = const_bytes + stream_bytes + io_bytes + scratch_bytes + act_bytes
    vmem_limit = int(min(64 * 2 ** 20, max(16 * 2 ** 20, 2 * est)))

    out2d = pl.pallas_call(
        functools.partial(transformer_block_kernel, n_heads=n_heads, d_k=d_k, dkp=dkp,
                          block_b=block_b, seq_len=S, approx_recip=approx_recip),
        out_shape=jax.ShapeDtypeStruct((B * S, H), io_dtype),
        grid_spec=pltpu.PrefetchScalarGridSpec(
            num_scalar_prefetch=0,
            grid=grid,
            in_specs=in_specs,
            out_specs=out_spec,
            scratch_shapes=scratch_shapes),
        compiler_params=pltpu.CompilerParams(
            dimension_semantics=("parallel", "arbitrary"),
            vmem_limit_bytes=vmem_limit),
    )(len2d, x2d, wqkv, bqkv, wo3, bo2, ln1a2, ln1b2,
      w1t, b12, w2t, b22, ln2a2, ln2b2)
    return out2d.reshape(B, S, H)


# ------------------------------ pure-JAX reference ---------------------------------

def transformer_block_ref(x, traj_len, params, n_heads):
    B, S, H = x.shape
    d_k = H // n_heads
    P = jax.lax.Precision.HIGHEST

    row = (jnp.arange(S)[None, :] < traj_len[:, None]).astype(jnp.float32)
    col = (jnp.arange(H)[None, :] < traj_len[:, None]).astype(jnp.float32)
    msum = jnp.sum(row[:, :, None] * col[:, None, :], axis=-1)               # (B, S)

    def ln(x, a, b, eps=1e-6):
        mean = x.mean(-1, keepdims=True)
        std = jnp.sqrt(jnp.sum((x - mean) ** 2, -1, keepdims=True) / (x.shape[-1] - 1))
        return a * (x - mean) / (std + eps) + b

    def lin(x, w, b):
        return jnp.einsum("...i,oi->...o", x, w, precision=P) + b

    def gelu(x):
        return 0.5 * x * (1 + jnp.tanh(math.sqrt(2 / math.pi) * (x + 0.044715 * x ** 3)))

    xn = ln(x, params["ln1_a"], params["ln1_b"])
    q = lin(xn, params["wq"], params["bq"]).reshape(B, S, n_heads, d_k).transpose(0, 2, 1, 3)
    k = lin(xn, params["wk"], params["bk"]).reshape(B, S, n_heads, d_k).transpose(0, 2, 1, 3)
    v = lin(xn, params["wv"], params["bv"]).reshape(B, S, n_heads, d_k).transpose(0, 2, 1, 3)
    scores = jnp.einsum("bhqd,bhkd->bhqk", q, k, precision=P) / math.sqrt(d_k)
    scores = jnp.where(msum == 0, -1e9, scores)     # same (B,S)->(B,h,S,S) broadcast as torch
    p = jax.nn.softmax(scores, axis=-1)
    ctx = jnp.einsum("bhqk,bhkd->bhqd", p, v, precision=P).transpose(0, 2, 1, 3).reshape(B, S, H)
    x1 = x + lin(ctx, params["wo"], params["bo"])
    xn2 = ln(x1, params["ln2_a"], params["ln2_b"])
    ff = lin(gelu(lin(xn2, params["w1"], params["b1"])), params["w2"], params["b2"])
    return x1 + ff


# ----------------------------------- driver ---------------------------------------

if __name__ == "__main__":
    # The PyTorch mask broadcast requires batch == seq (or batch == 1); use B == S.
    B, S, H, HEADS, D_FF = 8, 8, 32, 4, 64

    key = jax.random.PRNGKey(0)
    ks = jax.random.split(key, 16)
    w = lambda k, shape, s=0.05: (s * jax.random.normal(k, shape)).astype(jnp.float32)

    params = dict(
        wq=w(ks[0], (H, H)), bq=w(ks[1], (H,)),
        wk=w(ks[2], (H, H)), bk=w(ks[3], (H,)),
        wv=w(ks[4], (H, H)), bv=w(ks[5], (H,)),
        wo=w(ks[6], (H, H)), bo=w(ks[7], (H,)),
        ln1_a=jnp.ones((H,), jnp.float32), ln1_b=jnp.zeros((H,), jnp.float32),
        w1=w(ks[8], (D_FF, H)), b1=w(ks[9], (D_FF,)),
        w2=w(ks[10], (H, D_FF)), b2=w(ks[11], (H,)),
        ln2_a=jnp.ones((H,), jnp.float32), ln2_b=jnp.zeros((H,), jnp.float32),
    )

    x = (0.5 * jax.random.normal(ks[12], (B, S, H))).astype(jnp.float32)
    traj_len = jnp.array([8, 5, 3, 8, 2, 6, 4, 7], dtype=jnp.int32)

    out = transformer_block(x, traj_len, params, HEADS)
    out = jax.block_until_ready(out)

    ref = jax.block_until_ready(transformer_block_ref(x, traj_len, params, HEADS))
    np.testing.assert_allclose(np.asarray(out.astype(jnp.float32)), np.asarray(ref),
                               rtol=2e-2, atol=2e-2)

    print("KERNEL_OK")
</pallas_src>

<mosaic_0001>
module attributes {stable_mosaic.version = 11 : i64} {
  func.func @transformer_block_kernel(%arg0: i32, %arg1: i32, %arg2: memref<8x1xi32, #tpu.memory_space<vmem>>, %arg3: memref<16x32xbf16, #tpu.memory_space<vmem>>, %arg4: memref<32x1536xbf16, #tpu.memory_space<vmem>>, %arg5: memref<1x1536xf32, #tpu.memory_space<vmem>>, %arg6: memref<4x128x32xbf16, #tpu.memory_space<vmem>>, %arg7: memref<1x32xf32, #tpu.memory_space<vmem>>, %arg8: memref<1x32xf32, #tpu.memory_space<vmem>>, %arg9: memref<1x32xf32, #tpu.memory_space<vmem>>, %arg10: memref<32x64xbf16, #tpu.memory_space<vmem>>, %arg11: memref<1x64xf32, #tpu.memory_space<vmem>>, %arg12: memref<64x32xbf16, #tpu.memory_space<vmem>>, %arg13: memref<1x32xf32, #tpu.memory_space<vmem>>, %arg14: memref<1x32xf32, #tpu.memory_space<vmem>>, %arg15: memref<1x32xf32, #tpu.memory_space<vmem>>, %arg16: memref<16x32xbf16, #tpu.memory_space<vmem>>, %arg17: memref<16x32xf32, #tpu.memory_space<vmem>>, %arg18: memref<16x32xbf16, #tpu.memory_space<vmem>>, %arg19: memref<16x32xf32, #tpu.memory_space<vmem>>) attributes {dimension_semantics = [#tpu.dimension_semantics<parallel>, #tpu.dimension_semantics<arbitrary>], iteration_bounds = array<i64: 4, 1>, scalar_prefetch = 0 : i64, scratch_operands = 3 : i64, tpu.core_type = #tpu.core_type<tc>, window_params = [{pipeline_mode = #tpu.pipeline_mode<synchronous>, transform_indices = @transform_0, window_bounds = array<i64: 8, 1>}, {transform_indices = @transform_1, window_bounds = array<i64: 16, 32>}, {pipeline_mode = #tpu.pipeline_mode<synchronous>, transform_indices = @transform_2, window_bounds = array<i64: 32, 1536>}, {pipeline_mode = #tpu.pipeline_mode<synchronous>, transform_indices = @transform_3, window_bounds = array<i64: 1, 1536>}, {pipeline_mode = #tpu.pipeline_mode<synchronous>, transform_indices = @transform_4, window_bounds = array<i64: 4, 128, 32>}, {pipeline_mode = #tpu.pipeline_mode<synchronous>, transform_indices = @transform_5, window_bounds = array<i64: 1, 32>}, {pipeline_mode = #tpu.pipeline_mode<synchronous>, transform_indices = @transform_6, window_bounds = array<i64: 1, 32>}, {pipeline_mode = #tpu.pipeline_mode<synchronous>, transform_indices = @transform_7, window_bounds = array<i64: 1, 32>}, {transform_indices = @transform_8, window_bounds = array<i64: 32, 64>}, {transform_indices = @transform_9, window_bounds = array<i64: 1, 64>}, {transform_indices = @transform_10, window_bounds = array<i64: 64, 32>}, {pipeline_mode = #tpu.pipeline_mode<synchronous>, transform_indices = @transform_11, window_bounds = array<i64: 1, 32>}, {pipeline_mode = #tpu.pipeline_mode<synchronous>, transform_indices = @transform_12, window_bounds = array<i64: 1, 32>}, {pipeline_mode = #tpu.pipeline_mode<synchronous>, transform_indices = @transform_13, window_bounds = array<i64: 1, 32>}, {transform_indices = @transform_14, window_bounds = array<i64: 16, 32>}]} {
    %c0_i32 = arith.constant 0 : i32
    %0 = arith.cmpi eq, %arg1, %c0_i32 : i32
    %1 = arith.extui %0 : i1 to i32
    %c0_i32_0 = arith.constant 0 : i32
    %2 = arith.cmpi ne, %1, %c0_i32_0 : i32
    scf.if %2 {
      %c0_19 = arith.constant 0 : index
      %c0_20 = arith.constant 0 : index
      %31 = vector.load %arg3[%c0_19, %c0_20] : memref<16x32xbf16, #tpu.memory_space<vmem>>, vector<16x32xbf16>
      %32 = arith.extf %31 : vector<16x32xbf16> to vector<16x32xf32>
      %33 = tpu.iota {dimensions = array<i32: 1>} : vector<8x8xi32>
      %c0_21 = arith.constant 0 : index
      %c0_22 = arith.constant 0 : index
      %34 = vector.load %arg2[%c0_21, %c0_22] : memref<8x1xi32, #tpu.memory_space<vmem>>, vector<8x1xi32>
      %35 = vector.broadcast %34 : vector<8x1xi32> to vector<8x8xi32>
      %36 = arith.cmpi slt, %33, %35 : vector<8x8xi32>
      %cst_23 = arith.constant 0.000000e+00 : f32
      %cst_24 = arith.constant -1.000000e+09 : f32
      %37 = vector.broadcast %cst_23 : f32 to vector<8x8xf32>
      %38 = vector.broadcast %cst_24 : f32 to vector<8x8xf32>
      %39 = arith.select %36, %37, %38 : vector<8x8xi1>, vector<8x8xf32>
      %c0_25 = arith.constant 0 : index
      %c0_26 = arith.constant 0 : index
      %40 = vector.load %arg8[%c0_25, %c0_26] : memref<1x32xf32, #tpu.memory_space<vmem>>, vector<1x32xf32>
      %c0_27 = arith.constant 0 : index
      %c0_28 = arith.constant 0 : index
      %41 = vector.load %arg9[%c0_27, %c0_28] : memref<1x32xf32, #tpu.memory_space<vmem>>, vector<1x32xf32>
      %cst_29 = arith.constant dense<0.000000e+00> : vector<16xf32>
      %42 = vector.multi_reduction <add>, %32, %cst_29 [1] : vector<16x32xf32> to vector<16xf32>
      %43 = vector.shape_cast %42 : vector<16xf32> to vector<16x1xf32>
      %cst_30 = arith.constant 3.200000e+01 : f32
      %44 = vector.broadcast %cst_30 : f32 to vector<16x1xf32>
      %45 = arith.divf %43, %44 : vector<16x1xf32>
      %46 = vector.broadcast %45 : vector<16x1xf32> to vector<16x32xf32>
      %47 = arith.subf %32, %46 : vector<16x32xf32>
      %48 = arith.mulf %47, %47 : vector<16x32xf32>
      %cst_31 = arith.constant dense<0.000000e+00> : vector<16xf32>
      %49 = vector.multi_reduction <add>, %48, %cst_31 [1] : vector<16x32xf32> to vector<16xf32>
      %50 = vector.shape_cast %49 : vector<16xf32> to vector<16x1xf32>
      %cst_32 = arith.constant 3.100000e+01 : f32
      %51 = vector.broadcast %cst_32 : f32 to vector<16x1xf32>
      %52 = arith.divf %50, %51 : vector<16x1xf32>
      %53 = math.sqrt %52 : vector<16x1xf32>
      %cst_33 = arith.constant 9.99999997E-7 : f32
      %54 = vector.broadcast %cst_33 : f32 to vector<16x1xf32>
      %55 = arith.addf %53, %54 : vector<16x1xf32>
      %56 = tpu.reciprocal %55 {approx = true} : vector<16x1xf32> -> vector<16x1xf32>
      %57 = vector.broadcast %45 : vector<16x1xf32> to vector<16x32xf32>
      %58 = arith.subf %32, %57 : vector<16x32xf32>
      %59 = vector.broadcast %40 : vector<1x32xf32> to vector<16x32xf32>
      %60 = arith.mulf %59, %58 : vector<16x32xf32>
      %61 = vector.broadcast %56 : vector<16x1xf32> to vector<16x32xf32>
      %62 = arith.mulf %60, %61 : vector<16x32xf32>
      %63 = vector.broadcast %41 : vector<1x32xf32> to vector<16x32xf32>
      %64 = arith.addf %62, %63 : vector<16x32xf32>
      %65 = arith.truncf %64 : vector<16x32xf32> to vector<16x32xbf16>
      %c0_34 = arith.constant 0 : index
      %c0_35 = arith.constant 0 : index
      %66 = vector.load %arg4[%c0_34, %c0_35] : memref<32x1536xbf16, #tpu.memory_space<vmem>>, vector<32x1536xbf16>
      %cst_36 = arith.constant dense<0.000000e+00> : vector<16x1536xf32>
      %67 = tpu.matmul %65, %66, %cst_36 {dimension_numbers = #tpu.dot_dimension_numbers<[1], [0], [0], [1], [0, 0, 1, 1], [], []>} : vector<16x32xbf16>, vector<32x1536xbf16>, vector<16x1536xf32> -> vector<16x1536xf32>
      %c0_37 = arith.constant 0 : index
      %c0_38 = arith.constant 0 : index
      %68 = vector.load %arg5[%c0_37, %c0_38] : memref<1x1536xf32, #tpu.memory_space<vmem>>, vector<1x1536xf32>
      %69 = vector.broadcast %68 : vector<1x1536xf32> to vector<16x1536xf32>
      %70 = arith.addf %67, %69 : vector<16x1536xf32>
      %71 = arith.truncf %70 : vector<16x1536xf32> to vector<16x1536xbf16>
      %cst_39 = arith.constant 0.000000e+00 : f32
      %72 = vector.broadcast %cst_39 : f32 to vector<16x32xf32>
      %73 = vector.extract_strided_slice %71 {offsets = [0, 0], sizes = [16, 128], strides = [1, 1]} : vector<16x1536xbf16> to vector<16x128xbf16>
      %74 = vector.shape_cast %73 : vector<16x128xbf16> to vector<2x8x128xbf16>
      %75 = vector.extract_strided_slice %71 {offsets = [0, 128], sizes = [16, 128], strides = [1, 1]} : vector<16x1536xbf16> to vector<16x128xbf16>
      %76 = vector.shape_cast %75 : vector<16x128xbf16> to vector<2x8x128xbf16>
      %77 = vector.extract_strided_slice %71 {offsets = [0, 256], sizes = [16, 128], strides = [1, 1]} : vector<16x1536xbf16> to vector<16x128xbf16>
      %78 = vector.shape_cast %77 : vector<16x128xbf16> to vector<2x8x128xbf16>
      "tpu.trace_start"() <{level = 10 : i32, message = "bqd,bkd->bqk"}> : () -> ()
      %cst_40 = arith.constant dense<0.000000e+00> : vector<2x8x8xf32>
      %79 = tpu.matmul %74, %76, %cst_40 {dimension_numbers = #tpu.dot_dimension_numbers<[2], [2], [1], [1], [0, 0, 0, 1, 1, 1], [0], [0]>} : vector<2x8x128xbf16>, vector<2x8x128xbf16>, vector<2x8x8xf32> -> vector<2x8x8xf32>
      "tpu.trace_stop"() : () -> ()
      %cst_41 = arith.constant 0.353553385 : f32
      %80 = vector.broadcast %cst_41 : f32 to vector<2x8x8xf32>
      %81 = arith.mulf %79, %80 : vector<2x8x8xf32>
      %82 = vector.shape_cast %39 : vector<8x8xf32> to vector<1x8x8xf32>
      %83 = vector.broadcast %82 : vector<1x8x8xf32> to vector<2x8x8xf32>
      %84 = arith.addf %81, %83 : vector<2x8x8xf32>
      %cst_42 = arith.constant dense<0xFF800000> : vector<2x8xf32>
      %85 = vector.multi_reduction <maximumf>, %84, %cst_42 [2] : vector<2x8x8xf32> to vector<2x8xf32>
      %86 = vector.shape_cast %85 : vector<2x8xf32> to vector<2x8x1xf32>
      %87 = vector.broadcast %86 : vector<2x8x1xf32> to vector<2x8x8xf32>
      %88 = arith.subf %84, %87 : vector<2x8x8xf32>
      %89 = math.exp %88 : vector<2x8x8xf32>
      %cst_43 = arith.constant dense<0.000000e+00> : vector<2x8xf32>
      %90 = vector.multi_reduction <add>, %89, %cst_43 [2] : vector<2x8x8xf32> to vector<2x8xf32>
      %91 = vector.shape_cast %90 : vector<2x8xf32> to vector<2x8x1xf32>
      %92 = tpu.reciprocal %91 {approx = true} : vector<2x8x1xf32> -> vector<2x8x1xf32>
      %93 = vector.broadcast %92 : vector<2x8x1xf32> to vector<2x8x8xf32>
      %94 = arith.mulf %89, %93 : vector<2x8x8xf32>
      %95 = arith.truncf %94 : vector<2x8x8xf32> to vector<2x8x8xbf16>
      "tpu.trace_start"() <{level = 10 : i32, message = "bqk,bkd->bqd"}> : () -> ()
      %cst_44 = arith.constant dense<0.000000e+00> : vector<2x8x128xf32>
      %96 = tpu.matmul %95, %78, %cst_44 {dimension_numbers = #tpu.dot_dimension_numbers<[2], [1], [1], [2], [0, 0, 0, 1, 1, 2], [0], [0]>} : vector<2x8x8xbf16>, vector<2x8x128xbf16>, vector<2x8x128xf32> -> vector<2x8x128xf32>
      "tpu.trace_stop"() : () -> ()
      %97 = vector.shape_cast %96 : vector<2x8x128xf32> to vector<16x128xf32>
      %98 = arith.truncf %97 : vector<16x128xf32> to vector<16x128xbf16>
      %c0_45 = arith.constant 0 : index
      %c0_46 = arith.constant 0 : index
      %c0_47 = arith.constant 0 : index
      %99 = vector.load %arg6[%c0_45, %c0_46, %c0_47] : memref<4x128x32xbf16, #tpu.memory_space<vmem>>, vector<1x128x32xbf16>
      %100 = vector.shape_cast %99 : vector<1x128x32xbf16> to vector<128x32xbf16>
      %cst_48 = arith.constant dense<0.000000e+00> : vector<16x32xf32>
      %101 = tpu.matmul %98, %100, %cst_48 {dimension_numbers = #tpu.dot_dimension_numbers<[1], [0], [0], [1], [0, 0, 1, 1], [], []>} : vector<16x128xbf16>, vector<128x32xbf16>, vector<16x32xf32> -> vector<16x32xf32>
      %102 = arith.addf %72, %101 : vector<16x32xf32>
      %103 = vector.extract_strided_slice %71 {offsets = [0, 384], sizes = [16, 128], strides = [1, 1]} : vector<16x1536xbf16> to vector<16x128xbf16>
      %104 = vector.shape_cast %103 : vector<16x128xbf16> to vector<2x8x128xbf16>
      %105 = vector.extract_strided_slice %71 {offsets = [0, 512], sizes = [16, 128], strides = [1, 1]} : vector<16x1536xbf16> to vector<16x128xbf16>
      %106 = vector.shape_cast %105 : vector<16x128xbf16> to vector<2x8x128xbf16>
      %107 = vector.extract_strided_slice %71 {offsets = [0, 640], sizes = [16, 128], strides = [1, 1]} : vector<16x1536xbf16> to vector<16x128xbf16>
      %108 = vector.shape_cast %107 : vector<16x128xbf16> to vector<2x8x128xbf16>
      "tpu.trace_start"() <{level = 10 : i32, message = "bqd,bkd->bqk"}> : () -> ()
      %cst_49 = arith.constant dense<0.000000e+00> : vector<2x8x8xf32>
      %109 = tpu.matmul %104, %106, %cst_49 {dimension_numbers = #tpu.dot_dimension_numbers<[2], [2], [1], [1], [0, 0, 0, 1, 1, 1], [0], [0]>} : vector<2x8x128xbf16>, vector<2x8x128xbf16>, vector<2x8x8xf32> -> vector<2x8x8xf32>
      "tpu.trace_stop"() : () -> ()
      %cst_50 = arith.constant 0.353553385 : f32
      %110 = vector.broadcast %cst_50 : f32 to vector<2x8x8xf32>
      %111 = arith.mulf %109, %110 : vector<2x8x8xf32>
      %112 = vector.shape_cast %39 : vector<8x8xf32> to vector<1x8x8xf32>
      %113 = vector.broadcast %112 : vector<1x8x8xf32> to vector<2x8x8xf32>
      %114 = arith.addf %111, %113 : vector<2x8x8xf32>
      %cst_51 = arith.constant dense<0xFF800000> : vector<2x8xf32>
      %115 = vector.multi_reduction <maximumf>, %114, %cst_51 [2] : vector<2x8x8xf32> to vector<2x8xf32>
      %116 = vector.shape_cast %115 : vector<2x8xf32> to vector<2x8x1xf32>
      %117 = vector.broadcast %116 : vector<2x8x1xf32> to vector<2x8x8xf32>
      %118 = arith.subf %114, %117 : vector<2x8x8xf32>
      %119 = math.exp %118 : vector<2x8x8xf32>
      %cst_52 = arith.constant dense<0.000000e+00> : vector<2x8xf32>
      %120 = vector.multi_reduction <add>, %119, %cst_52 [2] : vector<2x8x8xf32> to vector<2x8xf32>
      %121 = vector.shape_cast %120 : vector<2x8xf32> to vector<2x8x1xf32>
      %122 = tpu.reciprocal %121 {approx = true} : vector<2x8x1xf32> -> vector<2x8x1xf32>
      %123 = vector.broadcast %122 : vector<2x8x1xf32> to vector<2x8x8xf32>
      %124 = arith.mulf %119, %123 : vector<2x8x8xf32>
      %125 = arith.truncf %124 : vector<2x8x8xf32> to vector<2x8x8xbf16>
      "tpu.trace_start"() <{level = 10 : i32, message = "bqk,bkd->bqd"}> : () -> ()
      %cst_53 = arith.constant dense<0.000000e+00> : vector<2x8x128xf32>
      %126 = tpu.matmul %125, %108, %cst_53 {dimension_numbers = #tpu.dot_dimension_numbers<[2], [1], [1], [2], [0, 0, 0, 1, 1, 2], [0], [0]>} : vector<2x8x8xbf16>, vector<2x8x128xbf16>, vector<2x8x128xf32> -> vector<2x8x128xf32>
      "tpu.trace_stop"() : () -> ()
      %127 = vector.shape_cast %126 : vector<2x8x128xf32> to vector<16x128xf32>
      %128 = arith.truncf %127 : vector<16x128xf32> to vector<16x128xbf16>
      %c1 = arith.constant 1 : index
      %c0_54 = arith.constant 0 : index
      %c0_55 = arith.constant 0 : index
      %129 = vector.load %arg6[%c1, %c0_54, %c0_55] : memref<4x128x32xbf16, #tpu.memory_space<vmem>>, vector<1x128x32xbf16>
      %130 = vector.shape_cast %129 : vector<1x128x32xbf16> to vector<128x32xbf16>
      %cst_56 = arith.constant dense<0.000000e+00> : vector<16x32xf32>
      %131 = tpu.matmul %128, %130, %cst_56 {dimension_numbers = #tpu.dot_dimension_numbers<[1], [0], [0], [1], [0, 0, 1, 1], [], []>} : vector<16x128xbf16>, vector<128x32xbf16>, vector<16x32xf32> -> vector<16x32xf32>
      %132 = arith.addf %102, %131 : vector<16x32xf32>
      %133 = vector.extract_strided_slice %71 {offsets = [0, 768], sizes = [16, 128], strides = [1, 1]} : vector<16x1536xbf16> to vector<16x128xbf16>
      %134 = vector.shape_cast %133 : vector<16x128xbf16> to vector<2x8x128xbf16>
      %135 = vector.extract_strided_slice %71 {offsets = [0, 896], sizes = [16, 128], strides = [1, 1]} : vector<16x1536xbf16> to vector<16x128xbf16>
      %136 = vector.shape_cast %135 : vector<16x128xbf16> to vector<2x8x128xbf16>
      %137 = vector.extract_strided_slice %71 {offsets = [0, 1024], sizes = [16, 128], strides = [1, 1]} : vector<16x1536xbf16> to vector<16x128xbf16>
      %138 = vector.shape_cast %137 : vector<16x128xbf16> to vector<2x8x128xbf16>
      "tpu.trace_start"() <{level = 10 : i32, message = "bqd,bkd->bqk"}> : () -> ()
      %cst_57 = arith.constant dense<0.000000e+00> : vector<2x8x8xf32>
      %139 = tpu.matmul %134, %136, %cst_57 {dimension_numbers = #tpu.dot_dimension_numbers<[2], [2], [1], [1], [0, 0, 0, 1, 1, 1], [0], [0]>} : vector<2x8x128xbf16>, vector<2x8x128xbf16>, vector<2x8x8xf32> -> vector<2x8x8xf32>
      "tpu.trace_stop"() : () -> ()
      %cst_58 = arith.constant 0.353553385 : f32
      %140 = vector.broadcast %cst_58 : f32 to vector<2x8x8xf32>
      %141 = arith.mulf %139, %140 : vector<2x8x8xf32>
      %142 = vector.shape_cast %39 : vector<8x8xf32> to vector<1x8x8xf32>
      %143 = vector.broadcast %142 : vector<1x8x8xf32> to vector<2x8x8xf32>
      %144 = arith.addf %141, %143 : vector<2x8x8xf32>
      %cst_59 = arith.constant dense<0xFF800000> : vector<2x8xf32>
      %145 = vector.multi_reduction <maximumf>, %144, %cst_59 [2] : vector<2x8x8xf32> to vector<2x8xf32>
      %146 = vector.shape_cast %145 : vector<2x8xf32> to vector<2x8x1xf32>
      %147 = vector.broadcast %146 : vector<2x8x1xf32> to vector<2x8x8xf32>
      %148 = arith.subf %144, %147 : vector<2x8x8xf32>
      %149 = math.exp %148 : vector<2x8x8xf32>
      %cst_60 = arith.constant dense<0.000000e+00> : vector<2x8xf32>
      %150 = vector.multi_reduction <add>, %149, %cst_60 [2] : vector<2x8x8xf32> to vector<2x8xf32>
      %151 = vector.shape_cast %150 : vector<2x8xf32> to vector<2x8x1xf32>
      %152 = tpu.reciprocal %151 {approx = true} : vector<2x8x1xf32> -> vector<2x8x1xf32>
      %153 = vector.broadcast %152 : vector<2x8x1xf32> to vector<2x8x8xf32>
      %154 = arith.mulf %149, %153 : vector<2x8x8xf32>
      %155 = arith.truncf %154 : vector<2x8x8xf32> to vector<2x8x8xbf16>
      "tpu.trace_start"() <{level = 10 : i32, message = "bqk,bkd->bqd"}> : () -> ()
      %cst_61 = arith.constant dense<0.000000e+00> : vector<2x8x128xf32>
      %156 = tpu.matmul %155, %138, %cst_61 {dimension_numbers = #tpu.dot_dimension_numbers<[2], [1], [1], [2], [0, 0, 0, 1, 1, 2], [0], [0]>} : vector<2x8x8xbf16>, vector<2x8x128xbf16>, vector<2x8x128xf32> -> vector<2x8x128xf32>
      "tpu.trace_stop"() : () -> ()
      %157 = vector.shape_cast %156 : vector<2x8x128xf32> to vector<16x128xf32>
      %158 = arith.truncf %157 : vector<16x128xf32> to vector<16x128xbf16>
      %c2 = arith.constant 2 : index
      %c0_62 = arith.constant 0 : index
      %c0_63 = arith.constant 0 : index
      %159 = vector.load %arg6[%c2, %c0_62, %c0_63] : memref<4x128x32xbf16, #tpu.memory_space<vmem>>, vector<1x128x32xbf16>
      %160 = vector.shape_cast %159 : vector<1x128x32xbf16> to vector<128x32xbf16>
      %cst_64 = arith.constant dense<0.000000e+00> : vector<16x32xf32>
      %161 = tpu.matmul %158, %160, %cst_64 {dimension_numbers = #tpu.dot_dimension_numbers<[1], [0], [0], [1], [0, 0, 1, 1], [], []>} : vector<16x128xbf16>, vector<128x32xbf16>, vector<16x32xf32> -> vector<16x32xf32>
      %162 = arith.addf %132, %161 : vector<16x32xf32>
      %163 = vector.extract_strided_slice %71 {offsets = [0, 1152], sizes = [16, 128], strides = [1, 1]} : vector<16x1536xbf16> to vector<16x128xbf16>
      %164 = vector.shape_cast %163 : vector<16x128xbf16> to vector<2x8x128xbf16>
      %165 = vector.extract_strided_slice %71 {offsets = [0, 1280], sizes = [16, 128], strides = [1, 1]} : vector<16x1536xbf16> to vector<16x128xbf16>
      %166 = vector.shape_cast %165 : vector<16x128xbf16> to vector<2x8x128xbf16>
      %167 = vector.extract_strided_slice %71 {offsets = [0, 1408], sizes = [16, 128], strides = [1, 1]} : vector<16x1536xbf16> to vector<16x128xbf16>
      %168 = vector.shape_cast %167 : vector<16x128xbf16> to vector<2x8x128xbf16>
      "tpu.trace_start"() <{level = 10 : i32, message = "bqd,bkd->bqk"}> : () -> ()
      %cst_65 = arith.constant dense<0.000000e+00> : vector<2x8x8xf32>
      %169 = tpu.matmul %164, %166, %cst_65 {dimension_numbers = #tpu.dot_dimension_numbers<[2], [2], [1], [1], [0, 0, 0, 1, 1, 1], [0], [0]>} : vector<2x8x128xbf16>, vector<2x8x128xbf16>, vector<2x8x8xf32> -> vector<2x8x8xf32>
      "tpu.trace_stop"() : () -> ()
      %cst_66 = arith.constant 0.353553385 : f32
      %170 = vector.broadcast %cst_66 : f32 to vector<2x8x8xf32>
      %171 = arith.mulf %169, %170 : vector<2x8x8xf32>
      %172 = vector.shape_cast %39 : vector<8x8xf32> to vector<1x8x8xf32>
      %173 = vector.broadcast %172 : vector<1x8x8xf32> to vector<2x8x8xf32>
      %174 = arith.addf %171, %173 : vector<2x8x8xf32>
      %cst_67 = arith.constant dense<0xFF800000> : vector<2x8xf32>
      %175 = vector.multi_reduction <maximumf>, %174, %cst_67 [2] : vector<2x8x8xf32> to vector<2x8xf32>
      %176 = vector.shape_cast %175 : vector<2x8xf32> to vector<2x8x1xf32>
      %177 = vector.broadcast %176 : vector<2x8x1xf32> to vector<2x8x8xf32>
      %178 = arith.subf %174, %177 : vector<2x8x8xf32>
      %179 = math.exp %178 : vector<2x8x8xf32>
      %cst_68 = arith.constant dense<0.000000e+00> : vector<2x8xf32>
      %180 = vector.multi_reduction <add>, %179, %cst_68 [2] : vector<2x8x8xf32> to vector<2x8xf32>
      %181 = vector.shape_cast %180 : vector<2x8xf32> to vector<2x8x1xf32>
      %182 = tpu.reciprocal %181 {approx = true} : vector<2x8x1xf32> -> vector<2x8x1xf32>
      %183 = vector.broadcast %182 : vector<2x8x1xf32> to vector<2x8x8xf32>
      %184 = arith.mulf %179, %183 : vector<2x8x8xf32>
      %185 = arith.truncf %184 : vector<2x8x8xf32> to vector<2x8x8xbf16>
      "tpu.trace_start"() <{level = 10 : i32, message = "bqk,bkd->bqd"}> : () -> ()
      %cst_69 = arith.constant dense<0.000000e+00> : vector<2x8x128xf32>
      %186 = tpu.matmul %185, %168, %cst_69 {dimension_numbers = #tpu.dot_dimension_numbers<[2], [1], [1], [2], [0, 0, 0, 1, 1, 2], [0], [0]>} : vector<2x8x8xbf16>, vector<2x8x128xbf16>, vector<2x8x128xf32> -> vector<2x8x128xf32>
      "tpu.trace_stop"() : () -> ()
      %187 = vector.shape_cast %186 : vector<2x8x128xf32> to vector<16x128xf32>
      %188 = arith.truncf %187 : vector<16x128xf32> to vector<16x128xbf16>
      %c3 = arith.constant 3 : index
      %c0_70 = arith.constant 0 : index
      %c0_71 = arith.constant 0 : index
      %189 = vector.load %arg6[%c3, %c0_70, %c0_71] : memref<4x128x32xbf16, #tpu.memory_space<vmem>>, vector<1x128x32xbf16>
      %190 = vector.shape_cast %189 : vector<1x128x32xbf16> to vector<128x32xbf16>
      %cst_72 = arith.constant dense<0.000000e+00> : vector<16x32xf32>
      %191 = tpu.matmul %188, %190, %cst_72 {dimension_numbers = #tpu.dot_dimension_numbers<[1], [0], [0], [1], [0, 0, 1, 1], [], []>} : vector<16x128xbf16>, vector<128x32xbf16>, vector<16x32xf32> -> vector<16x32xf32>
      %192 = arith.addf %162, %191 : vector<16x32xf32>
      %193 = arith.addf %32, %192 : vector<16x32xf32>
      %c0_73 = arith.constant 0 : index
      %c0_74 = arith.constant 0 : index
      %194 = vector.load %arg7[%c0_73, %c0_74] : memref<1x32xf32, #tpu.memory_space<vmem>>, vector<1x32xf32>
      %195 = vector.broadcast %194 : vector<1x32xf32> to vector<16x32xf32>
      %196 = arith.addf %193, %195 : vector<16x32xf32>
      %c0_75 = arith.constant 0 : index
      %c0_76 = arith.constant 0 : index
      %197 = vector.load %arg17[%c0_75, %c0_76] : memref<16x32xf32, #tpu.memory_space<vmem>>, vector<16x32xf32>
      tpu.vector_store %arg17[%c0_75, %c0_76], %196 {strides = array<i32>} : memref<16x32xf32, #tpu.memory_space<vmem>>, vector<16x32xf32>,
      %c0_77 = arith.constant 0 : index
      %c0_78 = arith.constant 0 : index
      %198 = vector.load %arg14[%c0_77, %c0_78] : memref<1x32xf32, #tpu.memory_space<vmem>>, vector<1x32xf32>
      %c0_79 = arith.constant 0 : index
      %c0_80 = arith.constant 0 : index
      %199 = vector.load %arg15[%c0_79, %c0_80] : memref<1x32xf32, #tpu.memory_space<vmem>>, vector<1x32xf32>
      %cst_81 = arith.constant dense<0.000000e+00> : vector<16xf32>
      %200 = vector.multi_reduction <add>, %196, %cst_81 [1] : vector<16x32xf32> to vector<16xf32>
      %201 = vector.shape_cast %200 : vector<16xf32> to vector<16x1xf32>
      %cst_82 = arith.constant 3.200000e+01 : f32
      %202 = vector.broadcast %cst_82 : f32 to vector<16x1xf32>
      %203 = arith.divf %201, %202 : vector<16x1xf32>
      %204 = vector.broadcast %203 : vector<16x1xf32> to vector<16x32xf32>
      %205 = arith.subf %196, %204 : vector<16x32xf32>
      %206 = arith.mulf %205, %205 : vector<16x32xf32>
      %cst_83 = arith.constant dense<0.000000e+00> : vector<16xf32>
      %207 = vector.multi_reduction <add>, %206, %cst_83 [1] : vector<16x32xf32> to vector<16xf32>
      %208 = vector.shape_cast %207 : vector<16xf32> to vector<16x1xf32>
      %cst_84 = arith.constant 3.100000e+01 : f32
      %209 = vector.broadcast %cst_84 : f32 to vector<16x1xf32>
      %210 = arith.divf %208, %209 : vector<16x1xf32>
      %211 = math.sqrt %210 : vector<16x1xf32>
      %cst_85 = arith.constant 9.99999997E-7 : f32
      %212 = vector.broadcast %cst_85 : f32 to vector<16x1xf32>
      %213 = arith.addf %211, %212 : vector<16x1xf32>
      %214 = tpu.reciprocal %213 {approx = true} : vector<16x1xf32> -> vector<16x1xf32>
      %215 = vector.broadcast %203 : vector<16x1xf32> to vector<16x32xf32>
      %216 = arith.subf %196, %215 : vector<16x32xf32>
      %217 = vector.broadcast %198 : vector<1x32xf32> to vector<16x32xf32>
      %218 = arith.mulf %217, %216 : vector<16x32xf32>
      %219 = vector.broadcast %214 : vector<16x1xf32> to vector<16x32xf32>
      %220 = arith.mulf %218, %219 : vector<16x32xf32>
      %221 = vector.broadcast %199 : vector<1x32xf32> to vector<16x32xf32>
      %222 = arith.addf %220, %221 : vector<16x32xf32>
      %223 = arith.truncf %222 : vector<16x32xf32> to vector<16x32xbf16>
      %c0_86 = arith.constant 0 : index
      %c0_87 = arith.constant 0 : index
      %224 = vector.load %arg18[%c0_86, %c0_87] : memref<16x32xbf16, #tpu.memory_space<vmem>>, vector<16x32xbf16>
      tpu.vector_store %arg18[%c0_86, %c0_87], %223 {strides = array<i32>} : memref<16x32xbf16, #tpu.memory_space<vmem>>, vector<16x32xbf16>,
      %cst_88 = arith.constant 0.000000e+00 : f32
      %225 = vector.broadcast %cst_88 : f32 to vector<16x32xf32>
      %c0_89 = arith.constant 0 : index
      %c0_90 = arith.constant 0 : index
      %226 = vector.load %arg19[%c0_89, %c0_90] : memref<16x32xf32, #tpu.memory_space<vmem>>, vector<16x32xf32>
      tpu.vector_store %arg19[%c0_89, %c0_90], %225 {strides = array<i32>} : memref<16x32xf32, #tpu.memory_space<vmem>>, vector<16x32xf32>,
    } else {
    }
    %c0 = arith.constant 0 : index
    %c0_1 = arith.constant 0 : index
    %3 = vector.load %arg18[%c0, %c0_1] : memref<16x32xbf16, #tpu.memory_space<vmem>>, vector<16x32xbf16>
    %c0_2 = arith.constant 0 : index
    %c0_3 = arith.constant 0 : index
    %4 = vector.load %arg10[%c0_2, %c0_3] : memref<32x64xbf16, #tpu.memory_space<vmem>>, vector<32x64xbf16>
    %cst = arith.constant dense<0.000000e+00> : vector<16x64xf32>
    %5 = tpu.matmul %3, %4, %cst {dimension_numbers = #tpu.dot_dimension_numbers<[1], [0], [0], [1], [0, 0, 1, 1], [], []>} : vector<16x32xbf16>, vector<32x64xbf16>, vector<16x64xf32> -> vector<16x64xf32>
    %c0_4 = arith.constant 0 : index
    %c0_5 = arith.constant 0 : index
    %6 = vector.load %arg11[%c0_4, %c0_5] : memref<1x64xf32, #tpu.memory_space<vmem>>, vector<1x64xf32>
    %7 = vector.broadcast %6 : vector<1x64xf32> to vector<16x64xf32>
    %8 = arith.addf %5, %7 : vector<16x64xf32>
    %cst_6 = arith.constant 5.000000e-01 : f32
    %9 = vector.broadcast %cst_6 : f32 to vector<16x64xf32>
    %10 = arith.mulf %9, %8 : vector<16x64xf32>
    %11 = arith.mulf %8, %8 : vector<16x64xf32>
    %12 = arith.mulf %8, %11 : vector<16x64xf32>
    %cst_7 = arith.constant 4.471500e-02 : f32
    %13 = vector.broadcast %cst_7 : f32 to vector<16x64xf32>
    %14 = arith.mulf %13, %12 : vector<16x64xf32>
    %15 = arith.addf %8, %14 : vector<16x64xf32>
    %cst_8 = arith.constant 0.797884583 : f32
    %16 = vector.broadcast %cst_8 : f32 to vector<16x64xf32>
    %17 = arith.mulf %16, %15 : vector<16x64xf32>
    %18 = math.tanh %17 : vector<16x64xf32>
    %cst_9 = arith.constant 1.000000e+00 : f32
    %19 = vector.broadcast %cst_9 : f32 to vector<16x64xf32>
    %20 = arith.addf %19, %18 : vector<16x64xf32>
    %21 = arith.mulf %10, %20 : vector<16x64xf32>
    %c0_10 = arith.constant 0 : index
    %c0_11 = arith.constant 0 : index
    %22 = vector.load %arg19[%c0_10, %c0_11] : memref<16x32xf32, #tpu.memory_space<vmem>>, vector<16x32xf32>
    %23 = arith.truncf %21 : vector<16x64xf32> to vector<16x64xbf16>
    %c0_12 = arith.constant 0 : index
    %c0_13 = arith.constant 0 : index
    %24 = vector.load %arg12[%c0_12, %c0_13] : memref<64x32xbf16, #tpu.memory_space<vmem>>, vector<64x32xbf16>
    %cst_14 = arith.constant dense<0.000000e+00> : vector<16x32xf32>
    %25 = tpu.matmul %23, %24, %cst_14 {dimension_numbers = #tpu.dot_dimension_numbers<[1], [0], [0], [1], [0, 0, 1, 1], [], []>} : vector<16x64xbf16>, vector<64x32xbf16>, vector<16x32xf32> -> vector<16x32xf32>
    %26 = arith.addf %22, %25 : vector<16x32xf32>
    %c0_15 = arith.constant 0 : index
    %c0_16 = arith.constant 0 : index
    %27 = vector.load %arg19[%c0_15, %c0_16] : memref<16x32xf32, #tpu.memory_space<vmem>>, vector<16x32xf32>
    tpu.vector_store %arg19[%c0_15, %c0_16], %26 {strides = array<i32>} : memref<16x32xf32, #tpu.memory_space<vmem>>, vector<16x32xf32>,
    %c0_i32_17 = arith.constant 0 : i32
    %28 = arith.cmpi eq, %arg1, %c0_i32_17 : i32
    %29 = arith.extui %28 : i1 to i32
    %c0_i32_18 = arith.constant 0 : i32
    %30 = arith.cmpi ne, %29, %c0_i32_18 : i32
    scf.if %30 {
      %c0_19 = arith.constant 0 : index
      %c0_20 = arith.constant 0 : index
      %31 = vector.load %arg17[%c0_19, %c0_20] : memref<16x32xf32, #tpu.memory_space<vmem>>, vector<16x32xf32>
      %c0_21 = arith.constant 0 : index
      %c0_22 = arith.constant 0 : index
      %32 = vector.load %arg19[%c0_21, %c0_22] : memref<16x32xf32, #tpu.memory_space<vmem>>, vector<16x32xf32>
      %33 = arith.addf %31, %32 : vector<16x32xf32>
      %c0_23 = arith.constant 0 : index
      %c0_24 = arith.constant 0 : index
      %34 = vector.load %arg13[%c0_23, %c0_24] : memref<1x32xf32, #tpu.memory_space<vmem>>, vector<1x32xf32>
      %35 = vector.broadcast %34 : vector<1x32xf32> to vector<16x32xf32>
      %36 = arith.addf %33, %35 : vector<16x32xf32>
      %37 = arith.truncf %36 : vector<16x32xf32> to vector<16x32xbf16>
      %c0_25 = arith.constant 0 : index
      %c0_26 = arith.constant 0 : index
      %38 = vector.load %arg16[%c0_25, %c0_26] : memref<16x32xbf16, #tpu.memory_space<vmem>>, vector<16x32xbf16>
      tpu.vector_store %arg16[%c0_25, %c0_26], %37 {strides = array<i32>} : memref<16x32xbf16, #tpu.memory_space<vmem>>, vector<16x32xbf16>,
    } else {
    }
    return
  }
  func.func @transform_0(%arg0: i32, %arg1: i32) -> (i32, i32) {
    %c0_i32 = arith.constant 0 : i32
    %c0_i32_0 = arith.constant 0 : i32
    %c0_i32_1 = arith.constant 0 : i32
    return %c0_i32, %c0_i32_0 : i32, i32
  }
  func.func @transform_1(%arg0: i32, %arg1: i32) -> (i32, i32) {
    %c0_i32 = arith.constant 0 : i32
    %c0_i32_0 = arith.constant 0 : i32
    return %arg0, %c0_i32 : i32, i32
  }
  func.func @transform_2(%arg0: i32, %arg1: i32) -> (i32, i32) {
    %c0_i32 = arith.constant 0 : i32
    %c0_i32_0 = arith.constant 0 : i32
    %c0_i32_1 = arith.constant 0 : i32
    return %c0_i32, %c0_i32_0 : i32, i32
  }
  func.func @transform_3(%arg0: i32, %arg1: i32) -> (i32, i32) {
    %c0_i32 = arith.constant 0 : i32
    %c0_i32_0 = arith.constant 0 : i32
    %c0_i32_1 = arith.constant 0 : i32
    return %c0_i32, %c0_i32_0 : i32, i32
  }
  func.func @transform_4(%arg0: i32, %arg1: i32) -> (i32, i32, i32) {
    %c0_i32 = arith.constant 0 : i32
    %c0_i32_0 = arith.constant 0 : i32
    %c0_i32_1 = arith.constant 0 : i32
    %c0_i32_2 = arith.constant 0 : i32
    return %c0_i32, %c0_i32_0, %c0_i32_1 : i32, i32, i32
  }
  func.func @transform_5(%arg0: i32, %arg1: i32) -> (i32, i32) {
    %c0_i32 = arith.constant 0 : i32
    %c0_i32_0 = arith.constant 0 : i32
    %c0_i32_1 = arith.constant 0 : i32
    return %c0_i32, %c0_i32_0 : i32, i32
  }
  func.func @transform_6(%arg0: i32, %arg1: i32) -> (i32, i32) {
    %c0_i32 = arith.constant 0 : i32
    %c0_i32_0 = arith.constant 0 : i32
    %c0_i32_1 = arith.constant 0 : i32
    return %c0_i32, %c0_i32_0 : i32, i32
  }
  func.func @transform_7(%arg0: i32, %arg1: i32) -> (i32, i32) {
    %c0_i32 = arith.constant 0 : i32
    %c0_i32_0 = arith.constant 0 : i32
    %c0_i32_1 = arith.constant 0 : i32
    return %c0_i32, %c0_i32_0 : i32, i32
  }
  func.func @transform_8(%arg0: i32, %arg1: i32) -> (i32, i32) {
    %c0_i32 = arith.constant 0 : i32
    %c0_i32_0 = arith.constant 0 : i32
    return %c0_i32, %arg1 : i32, i32
  }
  func.func @transform_9(%arg0: i32, %arg1: i32) -> (i32, i32) {
    %c0_i32 = arith.constant 0 : i32
    %c0_i32_0 = arith.constant 0 : i32
    return %c0_i32, %arg1 : i32, i32
  }
  func.func @transform_10(%arg0: i32, %arg1: i32) -> (i32, i32) {
    %c0_i32 = arith.constant 0 : i32
    %c0_i32_0 = arith.constant 0 : i32
    return %arg1, %c0_i32 : i32, i32
  }
  func.func @transform_11(%arg0: i32, %arg1: i32) -> (i32, i32) {
    %c0_i32 = arith.constant 0 : i32
    %c0_i32_0 = arith.constant 0 : i32
    %c0_i32_1 = arith.constant 0 : i32
    return %c0_i32, %c0_i32_0 : i32, i32
  }
  func.func @transform_12(%arg0: i32, %arg1: i32) -> (i32, i32) {
    %c0_i32 = arith.constant 0 : i32
    %c0_i32_0 = arith.constant 0 : i32
    %c0_i32_1 = arith.constant 0 : i32
    return %c0_i32, %c0_i32_0 : i32, i32
  }
  func.func @transform_13(%arg0: i32, %arg1: i32) -> (i32, i32) {
    %c0_i32 = arith.constant 0 : i32
    %c0_i32_0 = arith.constant 0 : i32
    %c0_i32_1 = arith.constant 0 : i32
    return %c0_i32, %c0_i32_0 : i32, i32
  }
  func.func @transform_14(%arg0: i32, %arg1: i32) -> (i32, i32) {
    %c0_i32 = arith.constant 0 : i32
    %c0_i32_0 = arith.constant 0 : i32
    return %arg0, %c0_i32 : i32, i32
  }
}

</mosaic_0001>

<bundles_post_ra>
// kernel: tpu_custom_call.1
= control target key start
LH: loop header
LB: loop body
LE: loop exit
PB: predicated region body
PF: predicated region fallthrough
CT: control target
= control target key end

     0   :  { %s3520_s29 = smov 0   ;;  %s3522_s30 = smov 0   ;;  %s4071_s0 = inlined_call_operand.vmem [shape: s32[8,1], index: 0, kind: input, shape index: {}]   ;;  %s4072_s1 = inlined_call_operand.vmem [shape: bf16[64,32], index: 1, kind: input, shape index: {}]   ;;  %s4073_s2 = inlined_call_operand.vmem [shape: bf16[32,1536], index: 2, kind: input, shape index: {}]   ;;  %s4074_s3 = inlined_call_operand.vmem [shape: f32[1,1536], index: 3, kind: input, shape index: {}]   ;;  %s4075_s4 = inlined_call_operand.vmem [shape: bf16[4,128,32], index: 4, kind: input, shape index: {}]   ;;  %s4076_s5 = inlined_call_operand.vmem [shape: f32[1,32], index: 5, kind: input, shape index: {}]   ;;  %s4077_s6 = inlined_call_operand.vmem [shape: f32[1,32], index: 6, kind: input, shape index: {}]   ;;  %s4078_s7 = inlined_call_operand.vmem [shape: f32[1,32], index: 7, kind: input, shape index: {}]   ;;  %s4079_s8 = inlined_call_operand.vmem [shape: bf16[32,64], index: 8, kind: input, shape index: {}]   ;;  %s4080_s9 = inlined_call_operand.vmem [shape: f32[1,64], index: 9, kind: input, shape index: {}]   ;;  %s4081_s10 = inlined_call_operand.vmem [shape: bf16[64,32], index: 10, kind: input, shape index: {}]   ;;  %s4082_s11 = inlined_call_operand.vmem [shape: f32[1,32], index: 11, kind: input, shape index: {}]   ;;  %s4083_s12 = inlined_call_operand.vmem [shape: f32[1,32], index: 12, kind: input, shape index: {}]   ;;  %s4084_s13 = inlined_call_operand.vmem [shape: f32[1,32], index: 13, kind: input, shape index: {}]   ;;  %s4085_s14 = inlined_call_operand.vmem [shape: bf16[64,32], index: 14, kind: output, shape index: {}]  }
   0x1   :  { %s3524_s15 = smov 0  }
   0x2 LB: > { %s36_s16 = sadd.s32 1, %s3435_s30  ;;  %p2794_p0 = scmp.ge.s32.totalorder %s3439_s15, 1  ;;  %s3439_s15 = sphi %s3524_s15, %s24_s15   ;;  %s3435_s30 = sphi %s3522_s30, %s4089_s30   ;;  %s3431_s29 = sphi %s3520_s29, %s4088_s29  }
   0x3   : > { %p38_p1 = scmp.ge.s32.totalorder %s36_s16, 4  ;;  %p453_p2 = scmp.lt.s32.totalorder %s3439_s15, 5 }
   0x5   : > { %s4091_s16 = smov (%p38_p1, %s36_s16), 0  ;;  %p454_p3 = pnand %p2794_p0, %p453_p2 }
   0x6   : > { %s2795_s17 = sshll.u32 (!%p454_p3), %s3431_s29, 1  ;;  %vm555_vm0 = vcmask (!%p454_p3), 261120   ;;  %v3291_v15 = vld [vmem:[%s4073_s2 + $0x4] ss:$48 sps:$4 sm:$0xff] (!%p454_p3)   ;;  %v3293_v16 = vld [vmem:[%s4073_s2 + $0xc] ss:$48 sps:$4 sm:$0xff] (!%p454_p3)  }
   0x7   : > { %457 = sbr.rel (%p454_p3) target bundleno = 4021 (0xfb5), region = 76  ;;  %p512_p4 = scmp.lt.s32.totalorder (!%p454_p3), %s2795_s17, 7  ;;  %v3295_v17 = vld [vmem:[%s4073_s2] ss:$48 sps:$4 sm:$0xff] (!%p454_p3)   ;;  %v3296_v18 = vld [vmem:[%s4073_s2 + $0x8] ss:$48 sps:$4 sm:$0xff] (!%p454_p3)   ;;  %826 = vmatprep.subr.bf16.mxu0 (!%p454_p3), %v3291_v15  ;;  %869 = vmatprep.subr.bf16.mxu1 (!%p454_p3), %v3293_v16 }
   0x8   : > { %v3297_v19 = vld [vmem:[%s4073_s2 + $0x64] ss:$48 sps:$4 sm:$0xff] (!%p454_p3)   ;;  %v3299_v20 = vld [vmem:[%s4073_s2 + $0x6c] ss:$48 sps:$4 sm:$0xff] (!%p454_p3)   ;;  %827 = vmatpush1.bf16.msra.mxu0 (!%p454_p3), %v3295_v17  ;;  %870 = vmatpush1.bf16.msra.mxu1 (!%p454_p3), %v3296_v18  ;;  %v3301_v21 = vld [vmem:[%s4073_s2 + $0x60] ss:$48 sps:$4 sm:$0xff] (!%p454_p3)  }
   0x9   : > { %v3302_v22 = vld [vmem:[%s4073_s2 + $0x68] ss:$48 sps:$4 sm:$0xff] (!%p454_p3)   ;;  %828 = vmatprep.subr.bf16.mxu0 (!%p454_p3), %v3297_v19  ;;  %871 = vmatprep.subr.bf16.mxu1 (!%p454_p3), %v3299_v20  ;;  %v3441_v23 = vmov (!%p454_p3), 0   ;;  %v3305_v24 = vld [vmem:[%s4073_s2 + $0x14] ss:$48 sps:$4 sm:$0xff] (!%p454_p3)   ;;  %vm3443_vm5 = vmmov (!%p454_p3), 0  }
   0xa   : > { %858 = vmatprep.mubr.bf16.mxu0 (!%p454_p3), %v3441_v23  ;;  %901 = vmatprep.mubr.bf16.mxu1 (!%p454_p3), %v3441_v23  ;;  %v3308_v25 = vld [vmem:[%s4073_s2 + $0x1c] ss:$48 sps:$4 sm:$0xff] (!%p454_p3)   ;;  %v2799_v42 = vld [vmem:[%s4077_s6] ss:$0 sm:$0xff] (!%p454_p3)  ;;  %v3306_v53 = vld [vmem:[%s4073_s2 + $0x18] ss:$48 sps:$4 sm:$0xff] (!%p454_p3)  }
   0xb   : > { %3290 = vset.pattern.permute.xlu0 (!%p454_p3), %v3441_v23  ;;  %v2800_v48 = vld [vmem:[%s4078_s7] ss:$0 sm:$0xff] (!%p454_p3)  ;;  %v3311_v55 = vld [vmem:[%s4073_s2 + $0x74] ss:$48 sps:$4 sm:$0xff] (!%p454_p3)   ;;  %v3314_v56 = vld [vmem:[%s4073_s2 + $0x7c] ss:$48 sps:$4 sm:$0xff] (!%p454_p3)  }
   0xc   : > { %829 = vmatpush1.bf16.msra.mxu0 (!%p454_p3), %v3301_v21  ;;  %872 = vmatpush1.bf16.msra.mxu1 (!%p454_p3), %v3302_v22  ;;  %v3303_v52 = vld [vmem:[%s4073_s2 + $0x10] ss:$48 sps:$4 sm:$0xff] (!%p454_p3)   ;;  %v3312_v58 = vld [vmem:[%s4073_s2 + $0x78] ss:$48 sps:$4 sm:$0xff] (!%p454_p3)   ;;  %v3317_v59 = vld [vmem:[%s4073_s2 + $0x24] ss:$48 sps:$4 sm:$0xff] (!%p454_p3)  }
   0xd   : > { %912 = vmatprep.subr.bf16.mxu0 (!%p454_p3), %v3305_v24  ;;  %955 = vmatprep.subr.bf16.mxu1 (!%p454_p3), %v3308_v25  ;;  %v3309_v57 = vld [vmem:[%s4073_s2 + $0x70] ss:$48 sps:$4 sm:$0xff] (!%p454_p3)   ;;  %v3320_v60 = vld [vmem:[%s4073_s2 + $0x2c] ss:$48 sps:$4 sm:$0xff] (!%p454_p3)   ;;  %v3318_v62 = vld [vmem:[%s4073_s2 + $0x28] ss:$48 sps:$4 sm:$0xff] (!%p454_p3)  }
   0xe   : > { %s4093_s17 = smov (!%p512_p4, %s2795_s17), 7  ;;  %v3315_v61 = vld [vmem:[%s4073_s2 + $0x20] ss:$48 sps:$4 sm:$0xff]   ;;  %v3323_v63 = vld [vmem:[%s4073_s2 + $0x84] ss:$48 sps:$4 sm:$0xff]   ;;  %vm1227_vm6 = vcmask 1043456  }
   0xf   : > { %s4086_s18 = sshll.u32 %s4093_s17, 2  ;;  %v547_v15 = vld [vmem:[%s4071_s0] sm:$0xff]  ;;  %vm1199_vm8 = vcmask 64512   ;;  %vm2602_vm13 = vcmask 523264   ;;  %s4087_s22 = sshll.u32 %s4093_s17, 2  ;;  %vm2677_vm14 = vcmask 257024  }
  0x10   : > { %s515_s21 = scalar_lea.vmem %s4072_s1, %s4086_s18  ;;  %v639_v16 = vld [vmem:[%s4074_s3] sm:$0xff]  ;;  %s534_s25 = scalar_lea.vmem %s4085_s14, %s4087_s22 }
  0x11   : > { %v2987_v0 = vld [vmem:[%s515_s21] sm:$0xff]  }
  0x12   : > { %v3546_v1 = vunpack.c.l.bf16 %v2987_v0  ;;  %v3548_v2 = vunpack.c.h.bf16 %v2987_v0  ;;  %v3326_v0 = vld [vmem:[%s4073_s2 + $0x8c] ss:$48 sps:$4 sm:$0xff]  }
  0x14   : > { %v556_v3 = vsel %vm555_vm0, %v3546_v1, 0.0  ;;  %v559_v4 = vsel %vm555_vm0, %v3548_v2, 0.0 }
  0x15   : > { %557 = vadd.xlane.f32.xlu0 %v556_v3  ;;  %v3321_v3 = vld [vmem:[%s4073_s2 + $0x80] ss:$48 sps:$4 sm:$0xff]  }
  0x19   : > { %560 = vadd.xlane.f32.xlu0 %v559_v4  ;;  %v3324_v4 = vld [vmem:[%s4073_s2 + $0x88] ss:$48 sps:$4 sm:$0xff]  }
  0x2f   : > { %549 = vperm.xlu0 %3290, %v547_v15  }
  0xa2   : > { %v558_v5 = vpop.xlane.xlu0 %557 }
  0xa3   : > { %v563_v6 = vmul.f32 0.03125, %v558_v5  ;;  %v545_v5 = vlaneseq }
  0xa5   : > { %v565_v7 = vsub.f32 %v3546_v1, %v563_v6  ;;  %v3442_v6 = vmov 0.0  }
  0xa6   : > { %v561_v8 = vpop.xlane.xlu0 %560  ;;  %2478 = vst.msk [vmem:[#allocation4] sm:$0xff] %vm555_vm0, %v3442_v6  ;;  %2479 = vst.msk [vmem:[#allocation4 + $0x8] sm:$0xff] %vm555_vm0, %v3442_v6 }
  0xa7   : > { %v564_v9 = vmul.f32 0.03125, %v561_v8  ;;  %v567_v10 = vmul.f32 %v565_v7, %v565_v7  ;;  %v602_v44 = vmul.f32 %v2799_v42, %v565_v7  ;;  %v3656_v7 = vshrl.u32 %v545_v5, 7 }
  0xa9   : > { %v566_v11 = vsub.f32 %v3548_v2, %v564_v9  ;;  %v569_v12 = vsel %vm555_vm0, %v567_v10, 0.0  ;;  %v653_v8 = vsub.s32 2, %v3656_v7  ;;  %v649_v9 = vsub.s32 1, %v3656_v7 }
  0xaa   : > { %570 = vadd.xlane.f32.xlu1 %v569_v12  ;;  %v657_v10 = vsub.s32 3, %v3656_v7  ;;  %v645_v19 = vsub.s32 0, %v3656_v7  ;;  %v661_v25 = vsub.s32 4, %v3656_v7 }
  0xab   : > { %v568_v13 = vmul.f32 %v566_v11, %v566_v11  ;;  %v603_v45 = vmul.f32 %v2799_v42, %v566_v11  ;;  %v640_v11 = vld [vmem:[%s4074_s3 + $0x8] sm:$0xf]  ;;  %v650_v17 = vrot.slane %v639_v16, %v649_v9  ;;  %v654_v22 = vrot.slane %v639_v16, %v653_v8 }
  0xac   : > { %v3668_v12 = vrot.slane %v640_v11, %v653_v8  ;;  %v3680_v18 = vrot.slane %v639_v16, %v657_v10 }
  0xad   : > { %v572_v14 = vsel %vm555_vm0, %v568_v13, 0.0  ;;  %v3670_v13 = vrot.slane %v640_v11, %v649_v9 }
  0xae   : > { %573 = vadd.xlane.f32.xlu1 %v572_v14  ;;  %v3672_v14 = vrot.slane %v640_v11, %v657_v10 }
 0x137   : > { %v571_v26 = vpop.xlane.xlu1 %570 }
 0x138   : > { %v576_v27 = vmul.f32 0.032258064, %v571_v26  ;;  %v669_v26 = vsub.s32 6, %v3656_v7 }
 0x13a   : > { %3365 = vrsqrt.f32 %v576_v27  ;;  %vm580_vm1 = vcmp.eq.f32.partialorder %v576_v27, inf  ;;  %v583_v32 = vand.u32 2147483648, %v576_v27  ;;  %vm582_vm2 = vcmp.eq.f32.partialorder %v576_v27, 0.0 }
 0x13b   : > { %v574_v28 = vpop.xlane.xlu1 %573 }
 0x13c   : > { %v577_v29 = vmul.f32 0.032258064, %v574_v28 }
 0x13e   : > { %3367 = vrsqrt.f32 %v577_v29  ;;  %vm587_vm3 = vcmp.eq.f32.partialorder %v577_v29, inf  ;;  %v590_v38 = vand.u32 2147483648, %v577_v29  ;;  %vm589_vm4 = vcmp.eq.f32.partialorder %v577_v29, 0.0 }
 0x144   : > { %v3366_v30 = vpop.eup %3365 }
 0x145   : > { %v579_v31 = vmul.f32 %v3366_v30, %v576_v27 }
 0x147   : > { %v581_v33 = vsel %vm580_vm1, %v576_v27, %v579_v31  ;;  %v665_v31 = vsub.s32 5, %v3656_v7 }
 0x148   : > { %v3368_v34 = vpop.eup %3367  ;;  %v584_v35 = vsel %vm582_vm2, %v583_v32, %v581_v33  ;;  %v673_v32 = vsub.s32 7, %v3656_v7  ;;  %v646_v33 = vrot.slane %v639_v16, %v645_v19 }
 0x149   : > { %v592_v36 = vadd.f32 1e-06, %v584_v35  ;;  %v586_v37 = vmul.f32 %v3368_v34, %v577_v29  ;;  %v666_v42 = vrot.slane %v639_v16, %v665_v31 }
 0x14b   : > { %3369 = vrcp.f32 %v592_v36  ;;  %v588_v39 = vsel %vm587_vm3, %v577_v29, %v586_v37 }
 0x14c   : > { %v591_v40 = vsel %vm589_vm4, %v590_v38, %v588_v39  ;;  %v3692_v39 = vrot.slane %v639_v16, %v661_v25 }
 0x14d   : > { %v593_v41 = vadd.f32 1e-06, %v591_v40  ;;  %v3694_v40 = vrot.slane %v639_v16, %v669_v26 }
 0x14f   : > { %3371 = vrcp.f32 %v593_v41 }
 0x155   : > { %v3370_v43 = vpop.eup %3369 }
 0x156   : > { %v604_v46 = vmul.f32 %v3370_v43, %v602_v44  ;;  %v3696_v43 = vrot.slane %v639_v16, %v673_v32 }
 0x158   : > { %v612_v50 = vadd.f32 %v2800_v48, %v604_v46 }
 0x159   : > { %v3372_v47 = vpop.eup %3371 }
 0x15a   : > { %v605_v49 = vmul.f32 %v3372_v47, %v603_v45 }
 0x15c   : > { %v613_v51 = vadd.f32 %v2800_v48, %v605_v49 }
 0x15e   : > { %v614_v54 = vpack.c.bf16 %v613_v51, %v612_v50 }
 0x160   : > { %2825 = vmatmul.mubr.msk.bf16.vlgmr.msra.gmra.mrb[0].mxu0 %vm555_vm0, %v614_v54  ;;  %2826 = vmatmul.mubr.msk.bf16.vlgmr.msra.gmra.mrb[0].mxu1 %vm555_vm0, %v614_v54 }
 0x161   : > { %913 = vmatpush1.bf16.msra.mxu0 %v3303_v52  ;;  %956 = vmatpush1.bf16.msra.mxu1 %v3306_v53 }
 0x162   : > { %914 = vmatprep.subr.bf16.mxu0 %v3311_v55  ;;  %957 = vmatprep.subr.bf16.mxu1 %v3314_v56 }
 0x163   : > { %944 = vmatprep.mubr.bf16.mxu0 %v3441_v23  ;;  %987 = vmatprep.mubr.bf16.mxu1 %v3441_v23 }
 0x165   : > { %915 = vmatpush1.bf16.msra.mxu0 %v3309_v57  ;;  %958 = vmatpush1.bf16.msra.mxu1 %v3312_v58 }
 0x166   : > { %998 = vmatprep.subr.bf16.mxu0 %v3317_v59  ;;  %1041 = vmatprep.subr.bf16.mxu1 %v3320_v60 }
 0x168   : > { %2827 = vmatmul.mubr.msk.bf16.vlgmr.msra.gmra.mrb[4].mxu0 %vm555_vm0, %v614_v54  ;;  %2828 = vmatmul.mubr.msk.bf16.vlgmr.msra.gmra.mrb[4].mxu1 %vm555_vm0, %v614_v54 }
 0x169   : > { %999 = vmatpush1.bf16.msra.mxu0 %v3315_v61  ;;  %1042 = vmatpush1.bf16.msra.mxu1 %v3318_v62 }
 0x16a   : > { %1000 = vmatprep.subr.bf16.mxu0 %v3323_v63  ;;  %1043 = vmatprep.subr.bf16.mxu1 %v3326_v0 }
 0x16b   : > { %1030 = vmatprep.mubr.bf16.mxu0 %v3441_v23  ;;  %1073 = vmatprep.mubr.bf16.mxu1 %v3441_v23 }
 0x16d   : > { %1001 = vmatpush1.bf16.msra.mxu0 %v3321_v3  ;;  %1044 = vmatpush1.bf16.msra.mxu1 %v3324_v4  ;;  %v678_v4 = vrot.slane %v640_v11, %v645_v19 }
 0x16e   : > { %3066 = vmatprep.subr.bf16.mxu0 %v3442_v6  ;;  %3072 = vmatprep.subr.bf16.mxu1 %v3442_v6 }
 0x170   : > { %2829 = vmatmul.mubr.msk.bf16.vlgmr.msra.gmra.mrb[8].mxu0 %vm555_vm0, %v614_v54  ;;  %2830 = vmatmul.mubr.msk.bf16.vlgmr.msra.gmra.mrb[8].mxu1 %vm555_vm0, %v614_v54 }
 0x171   : > { %3068 = vmatprep.mubr.msk.bf16.mxu0 %vm3443_vm5, %v3442_v6  ;;  %3074 = vmatprep.mubr.msk.bf16.mxu1 %vm3443_vm5, %v3442_v6 }
 0x233   : > { %v860_v20 = vpop.f32.mrb[0].mxu0  ;;  %v903_v21 = vpop.f32.mrb[0].mxu1 }
 0x234   : > { %v862_v23 = vpop.f32.mrb[1].mxu0  ;;  %v905_v24 = vpop.f32.mrb[1].mxu1  ;;  %v904_v38 = vadd.f32 %v903_v21, %v654_v22  ;;  %v861_v44 = vadd.f32 %v860_v20, %v646_v33 }
 0x235   : > { %v863_v27 = vadd.f32 %v862_v23, %v650_v17  ;;  %v3686_v28 = vadd.f32 %v905_v24, %v3680_v18  ;;  %v864_v29 = vpop.f32.mrb[2].mxu0  ;;  %v907_v30 = vpop.f32.mrb[2].mxu1 }
 0x236   : > { %v866_v34 = vpop.f32.mrb[3].mxu0  ;;  %v3690_v35 = vpop.f32.mrb[3].mxu1  ;;  %v908_v45 = vadd.f32 %v907_v30, %v654_v22  ;;  %v2964_v48 = vpack.c.bf16 %v904_v38, %v904_v38  ;;  %v865_v49 = vadd.f32 %v864_v29, %v646_v33  ;;  %v2960_v58 = vpack.c.bf16 %v861_v44, %v861_v44 }
 0x237   : > { %v2962_v36 = vpack.c.bf16 %v863_v27, %v863_v27  ;;  %v867_v37 = vadd.f32 %v866_v34, %v650_v17 }
 0x238   : > { %v2965_v59 = vpack.c.bf16 %v908_v45, %v908_v45  ;;  %v1229_v0 = vsel %vm1227_vm6, %v2964_v48, 0  ;;  %v2961_v3 = vpack.c.bf16 %v865_v49, %v865_v49 }
 0x239   : > { %v2963_v41 = vpack.c.bf16 %v867_v37, %v867_v37  ;;  %3067 = vmatpush3.bf16.xpose.msra.mxu0 %v2962_v36 }
 0x23a   : > { %3078 = vmatprep.subr.bf16.mxu0 %v3442_v6  ;;  %v1275_v9 = vsel %vm1227_vm6, %v2965_v59, 0 }
 0x23b   : > { %v946_v46 = vpop.f32.mrb[4].mxu0  ;;  %v989_v47 = vpop.f32.mrb[4].mxu1  ;;  %3073 = vmatpush3.bf16.xpose.msra.mxu1 %v2963_v41 }
 0x23c   : > { %v3700_v50 = vadd.f32 %v946_v46, %v3692_v39  ;;  %v3703_v51 = vadd.f32 %v989_v47, %v3694_v40  ;;  %v948_v52 = vpop.f32.mrb[5].mxu0  ;;  %v991_v53 = vpop.f32.mrb[5].mxu1  ;;  %3084 = vmatprep.subr.bf16.mxu1 %v3442_v6 }
 0x23d   : > { %v949_v54 = vadd.f32 %v948_v52, %v666_v42  ;;  %v3707_v55 = vadd.f32 %v991_v53, %v3696_v43  ;;  %v3709_v56 = vpop.f32.mrb[6].mxu0  ;;  %v3711_v57 = vpop.f32.mrb[6].mxu1  ;;  %v3444_v52 = vmov -1e+09  }
 0x23e   : > { %v952_v60 = vpop.f32.mrb[7].mxu0  ;;  %v3713_v61 = vpop.f32.mrb[7].mxu1 }
 0x23f   : > { %v2970_v62 = vpack.c.bf16 %v949_v54, %v949_v54  ;;  %v953_v63 = vadd.f32 %v952_v60, %v666_v42  ;;  %v546_v42 = vand.u32 127, %v545_v5 }
 0x240   : > { %3069 = vmatmul.mubr.bf16.vlgmr.msra.gmra.mrb[12].mxu0 %v2960_v58 }
 0x241   : > { %v3717_v7 = vsel %vm1227_vm6, %v2970_v62, 0  ;;  %v2971_v8 = vpack.c.bf16 %v953_v63, %v953_v63  ;;  %3079 = vmatpush3.bf16.msra.mxu0 %v1229_v0  ;;  %3080 = vmatprep.mubr.msk.bf16.mxu0 %vm3443_vm5, %v3442_v6 }
 0x242   : > { %3075 = vmatmul.mubr.bf16.vlgmr.msra.gmra.mrb[12].mxu1 %v2961_v3  ;;  %3090 = vmatprep.subr.bf16.mxu0 %v3442_v6 }
 0x243   : > { %v3724_v10 = vsel %vm1227_vm6, %v2971_v8, 0  ;;  %v1032_v15 = vpop.f32.mrb[8].mxu0  ;;  %v1075_v16 = vpop.f32.mrb[8].mxu1  ;;  %3085 = vmatpush3.bf16.msra.mxu1 %v1275_v9  ;;  %3086 = vmatprep.mubr.msk.bf16.mxu1 %vm3443_vm5, %v3442_v6 }
 0x244   : > { %v1033_v11 = vadd.f32 %v1032_v15, %v678_v4  ;;  %v3729_v17 = vadd.f32 %v1075_v16, %v3668_v12  ;;  %v1034_v19 = vpop.f32.mrb[9].mxu0  ;;  %v1077_v20 = vpop.f32.mrb[9].mxu1  ;;  %3096 = vmatprep.subr.bf16.mxu1 %v3442_v6 }
 0x245   : > { %v3733_v21 = vadd.f32 %v1034_v19, %v3670_v13  ;;  %v1078_v22 = vadd.f32 %v1077_v20, %v3672_v14  ;;  %v1036_v23 = vpop.f32.mrb[10].mxu0  ;;  %v1079_v24 = vpop.f32.mrb[10].mxu1 }
 0x246   : > { %v2976_v25 = vpack.c.bf16 %v1033_v11, %v1033_v11  ;;  %v1037_v26 = vadd.f32 %v1036_v23, %v678_v4  ;;  %v3737_v27 = vadd.f32 %v1079_v24, %v3668_v12  ;;  %v1038_v29 = vpop.f32.mrb[11].mxu0  ;;  %v1081_v30 = vpop.f32.mrb[11].mxu1 }
 0x247   : > { %v2982_v31 = vpack.c.bf16 %v1078_v22, %v1078_v22  ;;  %v3740_v32 = vadd.f32 %v1038_v29, %v3670_v13  ;;  %v1082_v33 = vadd.f32 %v1081_v30, %v3672_v14  ;;  %v550_v13 = vpop.permute.xlu0 %549  ;;  %v951_v22 = vadd.f32 %v3709_v56, %v3692_v39 }
 0x248   : > { %v3744_v34 = vsel %vm1227_vm6, %v2976_v25, 0  ;;  %v2977_v36 = vpack.c.bf16 %v1037_v26, %v1037_v26  ;;  %vm551_vm7 = vcmp.lt.s32.totalorder %v546_v42, %v550_v13  ;;  %v910_v26 = vadd.f32 %v3690_v35, %v3680_v18 }
 0x249   : > { %v3747_v37 = vsel %vm1227_vm6, %v2982_v31, 0  ;;  %v2983_v38 = vpack.c.bf16 %v1082_v33, %v1082_v33  ;;  %v3756_v53 = vsel %vm551_vm7, 0.0, %v3444_v52  ;;  %v2969_v25 = vpack.c.bf16 %v951_v22, %v951_v22 }
 0x24a   : > { %v3750_v41 = vsel %vm1227_vm6, %v2977_v36, 0  ;;  %v2967_v31 = vpack.c.bf16 %v910_v26, %v910_v26  ;;  %v2968_v35 = vpack.c.bf16 %v3700_v50, %v3700_v50  ;;  %v3328_v26 = vld [vmem:[%s4075_s4 + $0x8] sm:$0xff]  }
 0x24b   : > { %v3753_v12 = vsel %vm1227_vm6, %v2983_v38, 0 }
 0x313   : > { %v1149_v44 = vpop.f32.mrb[12].mxu0 }
 0x314   : > { %v3070_v14 = vpop.f32.mrb[13].mxu0  ;;  %v1195_v0 = vmul.f32 0.35355338, %v1149_v44 }
 0x315   : > { %v1152_v45 = vpop.f32.mrb[14].mxu0  ;;  %v1189_v46 = vpop.f32.mrb[12].mxu1 }
 0x316   : > { %v1196_v47 = vmul.f32 0.35355338, %v1189_v46  ;;  %v3071_v48 = vpop.f32.mrb[15].mxu0  ;;  %v3076_v49 = vpop.f32.mrb[13].mxu1  ;;  %v1197_v8 = vadd.f32 %v1195_v0, %v3756_v53 }
 0x317   : > { %v1192_v54 = vpop.f32.mrb[14].mxu1 }
 0x318   : > { %v3077_v58 = vpop.f32.mrb[15].mxu1  ;;  %v1198_v59 = vadd.f32 %v1196_v47, %v3756_v53  ;;  %v1200_v9 = vsel %vm1199_vm8, %v1197_v8, -inf }
 0x31a   : > { %v1203_v60 = vsel %vm1199_vm8, %v1198_v59, -inf }
 0x31b   : > { %1204 = vmax.xlane.f32.xlu1 %v1203_v60 }
 0x3a8   : > { %v1205_v5 = vpop.xlane.xlu1 %1204 }
 0x3a9   : > { %v1207_v62 = vsub.f32 %v1198_v59, %v1205_v5 }
 0x3ab   : > { %v1210_v63 = vmul.f32 1.442695, %v1207_v62 }
 0x3ad   : > { %3373 = vpow2.f32 %v1210_v63 }
 0x3b7   : > { %v3374_v3 = vpop.eup %3373 }
 0x3b8   : > { %v1215_v4 = vsel %vm1199_vm8, %v3374_v3, 0.0 }
 0x3b9   : > { %1216 = vadd.xlane.f32.xlu1 %v1215_v4 }
 0x3bd   : > { %1201 = vmax.xlane.f32.xlu1 %v1200_v9 }
 0x446   : > { %v1217_v15 = vpop.xlane.xlu1 %1216 }
 0x447   : > { %3375 = vrcp.f32 %v1217_v15 }
 0x44a   : > { %v1202_v16 = vpop.xlane.xlu1 %1201 }
 0x44b   : > { %v1206_v11 = vsub.f32 %v1197_v8, %v1202_v16 }
 0x44d   : > { %v1208_v19 = vmul.f32 1.442695, %v1206_v11 }
 0x44f   : > { %3377 = vpow2.f32 %v1208_v19 }
 0x451   : > { %v3376_v20 = vpop.eup %3375 }
 0x452   : > { %v1221_v23 = vmul.f32 %v3376_v20, %v3374_v3 }
 0x454   : > { %v1223_v24 = vpack.c.bf16 %v1221_v23, %v1221_v23 }
 0x456   : > { %3087 = vmatmul.mubr.msk.bf16.vlgmr.msra.gmra.mrb[16].mxu1 %vm1199_vm8, %v1223_v24  ;;  %v3327_v24 = vld [vmem:[%s4075_s4] sm:$0xff]  }
 0x457   : > { %3097 = vmatpush3.bf16.xpose.msra.mxu1 %v2969_v25  ;;  %3098 = vmatprep.mubr.msk.bf16.mxu1 %vm3443_vm5, %v3442_v6 }
 0x458   : > { %3108 = vmatprep.subr.bf16.mxu1 %v3442_v6 }
 0x459   : > { %v3378_v29 = vpop.eup %3377 }
 0x45a   : > { %v1212_v30 = vsel %vm1199_vm8, %v3378_v29, 0.0 }
 0x45b   : > { %1213 = vadd.xlane.f32.xlu1 %v1212_v30 }
 0x45e   : > { %3099 = vmatmul.mubr.bf16.vlgmr.msra.gmra.mrb[20].mxu1 %v2967_v31  ;;  %v3329_v31 = vld [vmem:[%s4075_s4 + $0x10] sm:$0xff]  }
 0x45f   : > { %3109 = vmatpush3.bf16.msra.mxu1 %v3724_v10  ;;  %3110 = vmatprep.mubr.msk.bf16.mxu1 %vm3443_vm5, %v3442_v6  ;;  %v2966_v10 = vpack.c.bf16 %v3686_v28, %v3686_v28 }
 0x460   : > { %3134 = vmatprep.subr.bf16.mxu1 %v3442_v6 }
 0x4e8   : > { %v1214_v39 = vpop.xlane.xlu1 %1213 }
 0x4e9   : > { %3379 = vrcp.f32 %v1214_v39  ;;  %v3330_v39 = vld [vmem:[%s4075_s4 + $0x18] sm:$0xff]  }
 0x4f3   : > { %v3380_v56 = vpop.eup %3379 }
 0x4f4   : > { %v1220_v33 = vmul.f32 %v3380_v56, %v3378_v29  ;;  %v3331_v56 = vld [vmem:[%s4075_s4 + $0x20] sm:$0xff]  }
 0x4f6   : > { %v1222_v18 = vpack.c.bf16 %v1220_v33, %v1220_v33  ;;  %v3332_v33 = vld [vmem:[%s4075_s4 + $0x28] sm:$0xff]  }
 0x4f8   : > { %3081 = vmatmul.mubr.msk.bf16.vlgmr.msra.gmra.mrb[16].mxu0 %vm1199_vm8, %v1222_v18  ;;  %v3333_v18 = vld [vmem:[%s4075_s4 + $0x30] sm:$0xff]  }
 0x4f9   : > { %3091 = vmatpush3.bf16.xpose.msra.mxu0 %v2968_v35  ;;  %3092 = vmatprep.mubr.msk.bf16.mxu0 %vm3443_vm5, %v3442_v6  ;;  %v3334_v35 = vld [vmem:[%s4075_s4 + $0x38] sm:$0xff]  }
 0x4fa   : > { %3102 = vmatprep.subr.bf16.mxu0 %v3442_v6 }
 0x500   : > { %3093 = vmatmul.mubr.bf16.vlgmr.msra.gmra.mrb[20].mxu0 %v2966_v10  ;;  %v996_v10 = vadd.f32 %v3713_v61, %v3696_v43 }
 0x501   : > { %3103 = vmatpush3.bf16.msra.mxu0 %v3717_v7  ;;  %3104 = vmatprep.mubr.msk.bf16.mxu0 %vm3443_vm5, %v3442_v6 }
 0x502   : > { %3114 = vmatprep.subr.bf16.mxu0 %v3442_v6 }
 0x529   : > { %v3788_v50 = vpop.f32.mrb[16].mxu1 }
 0x52a   : > { %v3088_v36 = vpop.f32.mrb[17].mxu1 }
 0x52b   : > { %v1314_v38 = vpop.f32.mrb[18].mxu1  ;;  %v994_v36 = vadd.f32 %v3711_v57, %v3694_v40  ;;  %v3336_v57 = vld [vmem:[%s4075_s4 + $0x48] sm:$0xff]  }
 0x52c   : > { %v3089_v42 = vpop.f32.mrb[19].mxu1 }
 0x52d   : > { %v2973_v38 = vpack.c.bf16 %v994_v36, %v994_v36 }
 0x531   : > { %v1427_v13 = vpop.f32.mrb[20].mxu1 }
 0x532   : > { %v1434_v44 = vmul.f32 0.35355338, %v1427_v13  ;;  %v3100_v14 = vpop.f32.mrb[21].mxu1  ;;  %v3335_v13 = vld [vmem:[%s4075_s4 + $0x40] sm:$0xff]  }
 0x533   : > { %v1430_v45 = vpop.f32.mrb[22].mxu1  ;;  %v3339_v14 = vld [vmem:[%s4075_s4 + $0x60] sm:$0xff]  }
 0x534   : > { %v3101_v46 = vpop.f32.mrb[23].mxu1  ;;  %v1436_v28 = vadd.f32 %v1434_v44, %v3756_v53  ;;  %v3338_v44 = vld [vmem:[%s4075_s4 + $0x58] sm:$0xff]   ;;  %v3340_v45 = vld [vmem:[%s4075_s4 + $0x68] sm:$0xff]  }
 0x535   : > { %v3341_v46 = vld [vmem:[%s4075_s4 + $0x70] sm:$0xff]  }
 0x536   : > { %v1440_v47 = vsel %vm1199_vm8, %v1436_v28, -inf }
 0x537   : > { %1441 = vmax.xlane.f32.xlu1 %v1440_v47 }
 0x5c4   : > { %v1442_v7 = vpop.xlane.xlu1 %1441 }
 0x5c5   : > { %v1444_v48 = vsub.f32 %v1436_v28, %v1442_v7  ;;  %v3342_v28 = vld [vmem:[%s4075_s4 + $0x78] sm:$0xff]  }
 0x5c7   : > { %v1447_v49 = vmul.f32 1.442695, %v1444_v48 }
 0x5c9   : > { %3381 = vpow2.f32 %v1447_v49 }
 0x5cb   : > { %v1265_v52 = vpop.f32.mrb[16].mxu0 }
 0x5cc   : > { %v1317_v54 = vpack.c.bf16 %v3788_v50, %v1265_v52  ;;  %v3082_v58 = vpop.f32.mrb[17].mxu0  ;;  %v2975_v50 = vpack.c.bf16 %v996_v10, %v996_v10 }
 0x5cd   : > { %v1268_v59 = vpop.f32.mrb[18].mxu0 }
 0x5ce   : > { %v3083_v60 = vpop.f32.mrb[19].mxu0 }
 0x5d3   : > { %v3382_v5 = vpop.eup %3381  ;;  %v1387_v62 = vpop.f32.mrb[20].mxu0 }
 0x5d4   : > { %v1433_v63 = vmul.f32 0.35355338, %v1387_v62  ;;  %v3094_v0 = vpop.f32.mrb[21].mxu0  ;;  %v1452_v3 = vsel %vm1199_vm8, %v3382_v5, 0.0 }
 0x5d5   : > { %v1390_v4 = vpop.f32.mrb[22].mxu0  ;;  %1453 = vadd.xlane.f32.xlu1 %v1452_v3 }
 0x5d6   : > { %v3095_v8 = vpop.f32.mrb[23].mxu0  ;;  %v1435_v9 = vadd.f32 %v1433_v63, %v3756_v53 }
 0x5d8   : > { %v1437_v15 = vsel %vm1199_vm8, %v1435_v9, -inf }
 0x5d9   : > { %1438 = vmax.xlane.f32.xlu1 %v1437_v15 }
 0x662   : > { %v1454_v16 = vpop.xlane.xlu1 %1453 }
 0x663   : > { %3383 = vrcp.f32 %v1454_v16  ;;  %v2974_v16 = vpack.c.bf16 %v3707_v55, %v3707_v55 }
 0x666   : > { %v1439_v11 = vpop.xlane.xlu1 %1438 }
 0x667   : > { %v1443_v19 = vsub.f32 %v1435_v9, %v1439_v11 }
 0x669   : > { %v1445_v20 = vmul.f32 1.442695, %v1443_v19 }
 0x66b   : > { %3385 = vpow2.f32 %v1445_v20  ;;  %v2972_v20 = vpack.c.bf16 %v3703_v51, %v3703_v51 }
 0x66d   : > { %v3384_v22 = vpop.eup %3383 }
 0x66e   : > { %v1458_v23 = vmul.f32 %v3384_v22, %v3382_v5 }
 0x670   : > { %v1460_v25 = vpack.c.bf16 %v1458_v23, %v1458_v23 }
 0x672   : > { %3111 = vmatmul.mubr.msk.bf16.vlgmr.msra.gmra.mrb[24].mxu1 %vm1199_vm8, %v1460_v25 }
 0x673   : > { %3135 = vmatpush3.bf16.msra.mxu1 %v3327_v24  ;;  %3150 = vmatprep.mubr.msk.bf16.mxu1 %vm3443_vm5, %v3442_v6 }
 0x674   : > { %3136 = vmatprep.subr.bf16.mxu1 %v3442_v6 }
 0x675   : > { %v3386_v29 = vpop.eup %3385 }
 0x676   : > { %v1449_v30 = vsel %vm1199_vm8, %v3386_v29, 0.0 }
 0x677   : > { %3137 = vmatpush3.bf16.msra.mxu1 %v3328_v26  ;;  %1450 = vadd.xlane.f32.xlu1 %v1449_v30 }
 0x678   : > { %3138 = vmatprep.subr.bf16.mxu1 %v3442_v6 }
 0x67b   : > { %3139 = vmatpush3.bf16.msra.mxu1 %v3329_v31  ;;  %v2978_v31 = vpack.c.bf16 %v3733_v21, %v3733_v21  ;;  %v2979_v21 = vpack.c.bf16 %v3740_v32, %v3740_v32 }
 0x67c   : > { %3140 = vmatprep.subr.bf16.mxu1 %v3442_v6 }
 0x67f   : > { %3141 = vmatpush3.bf16.msra.mxu1 %v3330_v39  ;;  %v2981_v39 = vpack.c.bf16 %v3737_v27, %v3737_v27 }
 0x680   : > { %3142 = vmatprep.subr.bf16.mxu1 %v3442_v6 }
 0x683   : > { %3143 = vmatpush3.bf16.msra.mxu1 %v3331_v56 }
 0x684   : > { %3144 = vmatprep.subr.bf16.mxu1 %v3442_v6 }
 0x687   : > { %3145 = vmatpush3.bf16.msra.mxu1 %v3332_v33 }
 0x688   : > { %3146 = vmatprep.subr.bf16.mxu1 %v3442_v6 }
 0x68b   : > { %3147 = vmatpush3.bf16.msra.mxu1 %v3333_v18 }
 0x68c   : > { %3148 = vmatprep.subr.bf16.mxu1 %v3442_v6 }
 0x68f   : > { %3149 = vmatpush3.bf16.msra.mxu1 %v3334_v35 }
 0x690   : > { %3160 = vmatprep.subr.bf16.mxu1 %v3442_v6 }
 0x692   : > { %3151 = vmatmul.mubr.bf16.vlgmr.msra.gmra.mrb[28].mxu1 %v1317_v54 }
 0x693   : > { %3162 = vmatprep.mubr.msk.bf16.mxu1 %vm3443_vm5, %v3442_v6 }
 0x698   : > { %3161 = vmatpush3.bf16.xpose.msra.mxu1 %v2975_v50 }
 0x699   : > { %3172 = vmatprep.subr.bf16.mxu1 %v3442_v6 }
 0x69f   : > { %3163 = vmatmul.mubr.bf16.vlgmr.msra.gmra.mrb[32].mxu1 %v2973_v38 }
 0x6a0   : > { %3173 = vmatpush3.bf16.msra.mxu1 %v3750_v41  ;;  %3174 = vmatprep.mubr.msk.bf16.mxu1 %vm3443_vm5, %v3442_v6  ;;  %v3337_v41 = vld [vmem:[%s4075_s4 + $0x50] sm:$0xff]  }
 0x6a1   : > { %3198 = vmatprep.subr.bf16.mxu1 %v3442_v6 }
 0x704   : > { %v1451_v43 = vpop.xlane.xlu1 %1450 }
 0x705   : > { %3387 = vrcp.f32 %v1451_v43 }
 0x70f   : > { %v3388_v61 = vpop.eup %3387 }
 0x710   : > { %v1457_v42 = vmul.f32 %v3388_v61, %v3386_v29 }
 0x712   : > { %v1459_v40 = vpack.c.bf16 %v1457_v42, %v1457_v42 }
 0x714   : > { %3105 = vmatmul.mubr.msk.bf16.vlgmr.msra.gmra.mrb[24].mxu0 %vm1199_vm8, %v1459_v40 }
 0x715   : > { %3115 = vmatpush3.bf16.msra.mxu0 %v3335_v13  ;;  %3130 = vmatprep.mubr.msk.bf16.mxu0 %vm3443_vm5, %v3442_v6 }
 0x716   : > { %3116 = vmatprep.subr.bf16.mxu0 %v3442_v6 }
 0x719   : > { %3117 = vmatpush3.bf16.msra.mxu0 %v3336_v57 }
 0x71a   : > { %3118 = vmatprep.subr.bf16.mxu0 %v3442_v6 }
 0x71d   : > { %3119 = vmatpush3.bf16.msra.mxu0 %v3337_v41 }
 0x71e   : > { %3120 = vmatprep.subr.bf16.mxu0 %v3442_v6 }
 0x721   : > { %3121 = vmatpush3.bf16.msra.mxu0 %v3338_v44 }
 0x722   : > { %3122 = vmatprep.subr.bf16.mxu0 %v3442_v6 }
 0x725   : > { %3123 = vmatpush3.bf16.msra.mxu0 %v3339_v14 }
 0x726   : > { %3124 = vmatprep.subr.bf16.mxu0 %v3442_v6 }
 0x729   : > { %3125 = vmatpush3.bf16.msra.mxu0 %v3340_v45 }
 0x72a   : > { %3126 = vmatprep.subr.bf16.mxu0 %v3442_v6 }
 0x72d   : > { %3127 = vmatpush3.bf16.msra.mxu0 %v3341_v46 }
 0x72e   : > { %3128 = vmatprep.subr.bf16.mxu0 %v3442_v6 }
 0x731   : > { %3129 = vmatpush3.bf16.msra.mxu0 %v3342_v28 }
 0x732   : > { %3154 = vmatprep.subr.bf16.mxu0 %v3442_v6 }
 0x745   : > { %v1547_v47 = vpop.f32.mrb[24].mxu1 }
 0x746   : > { %v3112_v7 = vpop.f32.mrb[25].mxu1 }
 0x747   : > { %v1550_v48 = vpop.f32.mrb[26].mxu1 }
 0x748   : > { %v3113_v49 = vpop.f32.mrb[27].mxu1 }
 0x765   : > { %v1742_v52 = vpop.f32.mrb[28].mxu1 }
 0x766   : > { %v3152_v54 = vpop.f32.mrb[29].mxu1 }
 0x767   : > { %v1745_v58 = vpop.f32.mrb[30].mxu1 }
 0x768   : > { %v3153_v59 = vpop.f32.mrb[31].mxu1 }
 0x772   : > { %v1842_v60 = vpop.f32.mrb[32].mxu1 }
 0x773   : > { %v1849_v5 = vmul.f32 0.35355338, %v1842_v60  ;;  %v3164_v62 = vpop.f32.mrb[33].mxu1 }
 0x774   : > { %v1845_v63 = vpop.f32.mrb[34].mxu1 }
 0x775   : > { %v3165_v0 = vpop.f32.mrb[35].mxu1  ;;  %v1851_v3 = vadd.f32 %v1849_v5, %v3756_v53 }
 0x777   : > { %v1855_v4 = vsel %vm1199_vm8, %v1851_v3, -inf }
 0x778   : > { %1856 = vmax.xlane.f32.xlu1 %v1855_v4 }
 0x7e7   : > { %v1501_v8 = vpop.f32.mrb[24].mxu0 }
 0x7e8   : > { %v1553_v9 = vpack.c.bf16 %v1547_v47, %v1501_v8  ;;  %v3106_v15 = vpop.f32.mrb[25].mxu0 }
 0x7e9   : > { %v1504_v11 = vpop.f32.mrb[26].mxu0 }
 0x7ea   : > { %v3107_v19 = vpop.f32.mrb[27].mxu0  ;;  %3131 = vmatmul.mubr.bf16.vlgmr.msra.gmra.mrb[28].mxu0 %v1553_v9 }
 0x7eb   : > { %3155 = vmatpush3.bf16.xpose.msra.mxu0 %v2974_v16  ;;  %3156 = vmatprep.mubr.msk.bf16.mxu0 %vm3443_vm5, %v3442_v6 }
 0x7ec   : > { %3166 = vmatprep.subr.bf16.mxu0 %v3442_v6 }
 0x7f2   : > { %3157 = vmatmul.mubr.bf16.vlgmr.msra.gmra.mrb[32].mxu0 %v2972_v20 }
 0x7f3   : > { %3167 = vmatpush3.bf16.msra.mxu0 %v3744_v34  ;;  %3168 = vmatprep.mubr.msk.bf16.mxu0 %vm3443_vm5, %v3442_v6  ;;  %v2980_v34 = vpack.c.bf16 %v3729_v17, %v3729_v17 }
 0x7f4   : > { %3178 = vmatprep.subr.bf16.mxu0 %v3442_v6 }
 0x805   : > { %v1857_v55 = vpop.xlane.xlu1 %1856 }
 0x806   : > { %v1859_v22 = vsub.f32 %v1851_v3, %v1857_v55 }
 0x808   : > { %v1862_v23 = vmul.f32 1.442695, %v1859_v22 }
 0x80a   : > { %3389 = vpow2.f32 %v1862_v23 }
 0x814   : > { %v3390_v24 = vpop.eup %3389 }
 0x815   : > { %v1867_v25 = vsel %vm1199_vm8, %v3390_v24, 0.0 }
 0x816   : > { %1868 = vadd.xlane.f32.xlu1 %v1867_v25  ;;  %v3344_v25 = vld [vmem:[%s4075_s4 + $0x88] sm:$0xff]  }
 0x8a3   : > { %v1869_v26 = vpop.xlane.xlu1 %1868 }
 0x8a4   : > { %3391 = vrcp.f32 %v1869_v26  ;;  %v3345_v26 = vld [vmem:[%s4075_s4 + $0x90] sm:$0xff]  }
 0x8ae   : > { %v3392_v29 = vpop.eup %3391 }
 0x8af   : > { %v1873_v51 = vmul.f32 %v3392_v29, %v3390_v24  ;;  %v3343_v24 = vld [vmem:[%s4075_s4 + $0x80] sm:$0xff]   ;;  %v3346_v29 = vld [vmem:[%s4075_s4 + $0x98] sm:$0xff]  }
 0x8b1   : > { %v1875_v30 = vpack.c.bf16 %v1873_v51, %v1873_v51  ;;  %v3347_v51 = vld [vmem:[%s4075_s4 + $0xa0] sm:$0xff]  }
 0x8b3   : > { %3175 = vmatmul.mubr.msk.bf16.vlgmr.msra.gmra.mrb[36].mxu1 %vm1199_vm8, %v1875_v30  ;;  %v3348_v30 = vld [vmem:[%s4075_s4 + $0xa8] sm:$0xff]  }
 0x8b4   : > { %3199 = vmatpush3.bf16.xpose.msra.mxu1 %v2980_v34  ;;  %3200 = vmatprep.mubr.msk.bf16.mxu1 %vm3443_vm5, %v3442_v6  ;;  %v3349_v34 = vld [vmem:[%s4075_s4 + $0xb0] sm:$0xff]  }
 0x8b5   : > { %3204 = vmatprep.subr.bf16.mxu1 %v3442_v6 }
 0x8bb   : > { %3201 = vmatmul.mubr.bf16.vlgmr.msra.gmra.mrb[40].mxu1 %v2978_v31  ;;  %v3350_v31 = vld [vmem:[%s4075_s4 + $0xb8] sm:$0xff]  }
 0x8bc   : > { %3205 = vmatpush3.bf16.xpose.msra.mxu1 %v2981_v39  ;;  %3206 = vmatprep.mubr.msk.bf16.mxu1 %vm3443_vm5, %v3442_v6 }
 0x8bd   : > { %v1653_v17 = vpop.f32.mrb[28].mxu0  ;;  %3210 = vmatprep.subr.bf16.mxu1 %v3442_v6 }
 0x8be   : > { %v3905_v56 = vadd.f32 %v1742_v52, %v1653_v17  ;;  %v3132_v33 = vpop.f32.mrb[29].mxu0 }
 0x8bf   : > { %v1656_v18 = vpop.f32.mrb[30].mxu0 }
 0x8c0   : > { %v3907_v35 = vadd.f32 %v1745_v58, %v1656_v18  ;;  %v3133_v10 = vpop.f32.mrb[31].mxu0 }
 0x8c3   : > { %3207 = vmatmul.mubr.bf16.vlgmr.msra.gmra.mrb[44].mxu1 %v2979_v21 }
 0x8c4   : > { %3211 = vmatpush3.bf16.msra.mxu1 %v3747_v37  ;;  %3212 = vmatprep.mubr.msk.bf16.mxu1 %vm3443_vm5, %v3442_v6 }
 0x8c5   : > { %v1802_v27 = vpop.f32.mrb[32].mxu0  ;;  %3216 = vmatprep.subr.bf16.mxu1 %v3442_v6 }
 0x8c6   : > { %v1848_v50 = vmul.f32 0.35355338, %v1802_v27  ;;  %v3158_v36 = vpop.f32.mrb[33].mxu0 }
 0x8c7   : > { %v1805_v38 = vpop.f32.mrb[34].mxu0 }
 0x8c8   : > { %v3159_v43 = vpop.f32.mrb[35].mxu0  ;;  %v1850_v61 = vadd.f32 %v1848_v50, %v3756_v53  ;;  %v3351_v38 = vld [vmem:[%s4075_s4 + $0xc0] sm:$0xff]  }
 0x8ca   : > { %v1852_v42 = vsel %vm1199_vm8, %v1850_v61, -inf }
 0x8cb   : > { %1853 = vmax.xlane.f32.xlu1 %v1852_v42 }
 0x958   : > { %v1854_v32 = vpop.xlane.xlu1 %1853 }
 0x959   : > { %v1858_v41 = vsub.f32 %v1850_v61, %v1854_v32  ;;  %v3352_v32 = vld [vmem:[%s4075_s4 + $0xc8] sm:$0xff]  }
 0x95b   : > { %v1860_v44 = vmul.f32 1.442695, %v1858_v41  ;;  %v3357_v41 = vld [vmem:[%s4075_s4 + $0xf0] sm:$0xff]  }
 0x95d   : > { %3393 = vpow2.f32 %v1860_v44  ;;  %v3358_v44 = vld [vmem:[%s4075_s4 + $0xf8] sm:$0xff]  }
 0x967   : > { %v3394_v62 = vpop.eup %3393 }
 0x968   : > { %v1864_v63 = vsel %vm1199_vm8, %v3394_v62, 0.0 }
 0x986   : > { %v3917_v13 = vpop.f32.mrb[36].mxu1 }
 0x987   : > { %v3176_v40 = vpop.f32.mrb[37].mxu1 }
 0x988   : > { %v1965_v37 = vpop.f32.mrb[38].mxu1  ;;  %v3353_v40 = vld [vmem:[%s4075_s4 + $0xd0] sm:$0xff]  }
 0x989   : > { %v3177_v57 = vpop.f32.mrb[39].mxu1  ;;  %v3355_v37 = vld [vmem:[%s4075_s4 + $0xe0] sm:$0xff]  }
 0x98a   : > { %v3356_v57 = vld [vmem:[%s4075_s4 + $0xe8] sm:$0xff]  }
 0x98e   : > { %v2130_v14 = vpop.f32.mrb[40].mxu1 }
 0x98f   : > { %v2176_v45 = vmul.f32 0.35355338, %v2130_v14  ;;  %v3202_v46 = vpop.f32.mrb[41].mxu1 }
 0x990   : > { %v2133_v28 = vpop.f32.mrb[42].mxu1 }
 0x991   : > { %v3203_v47 = vpop.f32.mrb[43].mxu1  ;;  %v2178_v7 = vadd.f32 %v2176_v45, %v3756_v53 }
 0x993   : > { %v2180_v48 = vsel %vm1199_vm8, %v2178_v7, -inf }
 0x994   : > { %2181 = vmax.xlane.f32.xlu0 %v2180_v48 }
 0x996   : > { %v2170_v49 = vpop.f32.mrb[44].mxu1 }
 0x997   : > { %v2177_v52 = vmul.f32 0.35355338, %v2170_v49  ;;  %v3208_v54 = vpop.f32.mrb[45].mxu1 }
 0x998   : > { %v2173_v58 = vpop.f32.mrb[46].mxu1 }
 0x999   : > { %v3209_v59 = vpop.f32.mrb[47].mxu1  ;;  %v2179_v60 = vadd.f32 %v2177_v52, %v3756_v53 }
 0x99b   : > { %v2183_v5 = vsel %vm1199_vm8, %v2179_v60, -inf }
 0x99c   : > { %2184 = vmax.xlane.f32.xlu1 %v2183_v5 }
 0x9a0   : > { %1865 = vadd.xlane.f32.xlu1 %v1864_v63 }
 0xa21   : > { %v2182_v0 = vpop.xlane.xlu0 %2181 }
 0xa22   : > { %v2186_v3 = vsub.f32 %v2178_v7, %v2182_v0 }
 0xa24   : > { %v2188_v4 = vmul.f32 1.442695, %v2186_v3 }
 0xa26   : > { %3395 = vpow2.f32 %v2188_v4  ;;  %v2943_v4 = vld [vmem:[%s4076_s5] ss:$0 sm:$0xff] }
 0xa29   : > { %v2185_v8 = vpop.xlane.xlu1 %2184 }
 0xa2a   : > { %v2187_v9 = vsub.f32 %v2179_v60, %v2185_v8 }
 0xa2c   : > { %v2190_v15 = vmul.f32 1.442695, %v2187_v9 }
 0xa2d   : > { %v1866_v16 = vpop.xlane.xlu1 %1865 }
 0xa2e   : > { %3397 = vpow2.f32 %v2190_v15 }
 0xa2f   : > { %3399 = vrcp.f32 %v1866_v16 }
 0xa30   : > { %v3396_v11 = vpop.eup %3395 }
 0xa31   : > { %v2192_v53 = vsel %vm1199_vm8, %v3396_v11, 0.0 }
 0xa32   : > { %2193 = vadd.xlane.f32.xlu1 %v2192_v53 }
 0xa38   : > { %v3398_v19 = vpop.eup %3397 }
 0xa39   : > { %v3400_v20 = vpop.eup %3399  ;;  %v2195_v55 = vsel %vm1199_vm8, %v3398_v19, 0.0 }
 0xa3a   : > { %v1872_v22 = vmul.f32 %v3400_v20, %v3394_v62  ;;  %2196 = vadd.xlane.f32.xlu1 %v2195_v55 }
 0xa3c   : > { %v1874_v23 = vpack.c.bf16 %v1872_v22, %v1872_v22 }
 0xa3e   : > { %3169 = vmatmul.mubr.msk.bf16.vlgmr.msra.gmra.mrb[36].mxu0 %vm1199_vm8, %v1874_v23 }
 0xa3f   : > { %3194 = vmatprep.mubr.msk.bf16.mxu0 %vm3443_vm5, %v3442_v6  ;;  %3179 = vmatpush3.bf16.msra.mxu0 %v3343_v24 }
 0xa40   : > { %3180 = vmatprep.subr.bf16.mxu0 %v3442_v6 }
 0xa43   : > { %3181 = vmatpush3.bf16.msra.mxu0 %v3344_v25 }
 0xa44   : > { %3182 = vmatprep.subr.bf16.mxu0 %v3442_v6 }
 0xa47   : > { %3183 = vmatpush3.bf16.msra.mxu0 %v3345_v26 }
 0xa48   : > { %3184 = vmatprep.subr.bf16.mxu0 %v3442_v6 }
 0xa4b   : > { %3185 = vmatpush3.bf16.msra.mxu0 %v3346_v29 }
 0xa4c   : > { %3186 = vmatprep.subr.bf16.mxu0 %v3442_v6 }
 0xa4f   : > { %3187 = vmatpush3.bf16.msra.mxu0 %v3347_v51  ;;  %v3359_v51 = vld [vmem:[%s4079_s8] sm:$0xff]  }
 0xa50   : > { %3188 = vmatprep.subr.bf16.mxu0 %v3442_v6 }
 0xa53   : > { %3189 = vmatpush3.bf16.msra.mxu0 %v3348_v30  ;;  %v3360_v30 = vld [vmem:[%s4079_s8 + $0x8] sm:$0xff]  }
 0xa54   : > { %3190 = vmatprep.subr.bf16.mxu0 %v3442_v6 }
 0xa57   : > { %3191 = vmatpush3.bf16.msra.mxu0 %v3349_v34 }
 0xa58   : > { %3192 = vmatprep.subr.bf16.mxu0 %v3442_v6 }
 0xa5b   : > { %3193 = vmatpush3.bf16.msra.mxu0 %v3350_v31 }
 0xa5c   : > { %3222 = vmatprep.subr.bf16.mxu0 %v3442_v6 }
 0xabf   : > { %v2194_v39 = vpop.xlane.xlu1 %2193 }
 0xac0   : > { %3401 = vrcp.f32 %v2194_v39 }
 0xac7   : > { %v2197_v17 = vpop.xlane.xlu1 %2196 }
 0xac8   : > { %3403 = vrcp.f32 %v2197_v17 }
 0xaca   : > { %v3402_v33 = vpop.eup %3401 }
 0xacb   : > { %v2200_v18 = vmul.f32 %v3402_v33, %v3396_v11 }
 0xacd   : > { %v2202_v10 = vpack.c.bf16 %v2200_v18, %v2200_v18 }
 0xacf   : > { %3213 = vmatmul.mubr.msk.bf16.vlgmr.msra.gmra.mrb[48].mxu1 %vm1199_vm8, %v2202_v10 }
 0xad0   : > { %3217 = vmatpush3.bf16.msra.mxu1 %v3753_v12  ;;  %3218 = vmatprep.mubr.msk.bf16.mxu1 %vm3443_vm5, %v3442_v6 }
 0xad1   : > { %3242 = vmatprep.subr.bf16.mxu1 %v3442_v6 }
 0xad2   : > { %v3404_v21 = vpop.eup %3403 }
 0xad3   : > { %v2201_v27 = vmul.f32 %v3404_v21, %v3398_v19 }
 0xad5   : > { %v2203_v50 = vpack.c.bf16 %v2201_v27, %v2201_v27 }
 0xad7   : > { %3219 = vmatmul.mubr.msk.bf16.vlgmr.msra.gmra.mrb[52].mxu1 %vm1199_vm8, %v2203_v50 }
 0xad8   : > { %3246 = vmatprep.mubr.msk.bf16.mxu1 %vm3443_vm5, %v3442_v6  ;;  %3243 = vmatpush3.bf16.msra.mxu1 %v3359_v51 }
 0xad9   : > { %3244 = vmatprep.subr.bf16.mxu1 %v3442_v6 }
 0xadc   : > { %3245 = vmatpush3.bf16.msra.mxu1 %v3360_v30 }
 0xadd   : > { %3250 = vmatprep.subr.bf16.mxu1 %v3442_v6 }
 0xb11   : > { %v1916_v36 = vpop.f32.mrb[36].mxu0 }
 0xb12   : > { %v1968_v12 = vpack.c.bf16 %v3917_v13, %v1916_v36  ;;  %v3170_v43 = vpop.f32.mrb[37].mxu0  ;;  %v3354_v13 = vld [vmem:[%s4075_s4 + $0xd8] sm:$0xff]  }
 0xb13   : > { %v1919_v61 = vpop.f32.mrb[38].mxu0 }
 0xb14   : > { %v3171_v42 = vpop.f32.mrb[39].mxu0  ;;  %3195 = vmatmul.mubr.bf16.vlgmr.msra.gmra.mrb[40].mxu0 %v1968_v12 }
 0xb15   : > { %3223 = vmatpush3.bf16.msra.mxu0 %v3351_v38  ;;  %3238 = vmatprep.mubr.msk.bf16.mxu0 %vm3443_vm5, %v3442_v6 }
 0xb16   : > { %3224 = vmatprep.subr.bf16.mxu0 %v3442_v6 }
 0xb19   : > { %3225 = vmatpush3.bf16.msra.mxu0 %v3352_v32  ;;  %v2944_v32 = vld [vmem:[%s4083_s12] ss:$0 sm:$0xff] }
 0xb1a   : > { %3226 = vmatprep.subr.bf16.mxu0 %v3442_v6 }
 0xb1d   : > { %3227 = vmatpush3.bf16.msra.mxu0 %v3353_v40 }
 0xb1e   : > { %3228 = vmatprep.subr.bf16.mxu0 %v3442_v6 }
 0xb21   : > { %3229 = vmatpush3.bf16.msra.mxu0 %v3354_v13 }
 0xb22   : > { %3230 = vmatprep.subr.bf16.mxu0 %v3442_v6 }
 0xb25   : > { %3231 = vmatpush3.bf16.msra.mxu0 %v3355_v37 }
 0xb26   : > { %3232 = vmatprep.subr.bf16.mxu0 %v3442_v6 }
 0xb29   : > { %3233 = vmatpush3.bf16.msra.mxu0 %v3356_v57 }
 0xb2a   : > { %3234 = vmatprep.subr.bf16.mxu0 %v3442_v6 }
 0xb2d   : > { %3235 = vmatpush3.bf16.msra.mxu0 %v3357_v41 }
 0xb2e   : > { %3236 = vmatprep.subr.bf16.mxu0 %v3442_v6 }
 0xb31   : > { %3237 = vmatpush3.bf16.msra.mxu0 %v3358_v44  ;;  %v2945_v44 = vld [vmem:[%s4084_s13] ss:$0 sm:$0xff] }
 0xba2   : > { %v2244_v14 = vpop.f32.mrb[48].mxu1 }
 0xba3   : > { %v3214_v45 = vpop.f32.mrb[49].mxu1 }
 0xba4   : > { %v2247_v46 = vpop.f32.mrb[50].mxu1 }
 0xba5   : > { %v3215_v28 = vpop.f32.mrb[51].mxu1 }
 0xbaa   : > { %v2290_v47 = vpop.f32.mrb[52].mxu1 }
 0xbab   : > { %v2296_v7 = vpack.c.bf16 %v2290_v47, %v2244_v14  ;;  %v3220_v48 = vpop.f32.mrb[53].mxu1 }
 0xbac   : > { %v2293_v49 = vpop.f32.mrb[54].mxu1  ;;  %v3362_v48 = vld [vmem:[%s4081_s10 + $0x8] sm:$0xff]  }
 0xbad   : > { %v3221_v52 = vpop.f32.mrb[55].mxu1  ;;  %3239 = vmatmul.mubr.bf16.vlgmr.msra.gmra.mrb[44].mxu0 %v2296_v7  ;;  %v3361_v7 = vld [vmem:[%s4081_s10] sm:$0xff]   ;;  %v3363_v49 = vld [vmem:[%s4081_s10 + $0x10] sm:$0xff]  }
 0xbae   : > { %v3364_v52 = vld [vmem:[%s4081_s10 + $0x18] sm:$0xff]  }
 0xbe7   : > { %v2068_v54 = vpop.f32.mrb[40].mxu0 }
 0xbe8   : > { %v2075_v58 = vadd.f32 %v2068_v54, %v3905_v56  ;;  %v3196_v59 = vpop.f32.mrb[41].mxu0  ;;  %v2946_v54 = vld [vmem:[%s4080_s9] ss:$0 sm:$0xff] }
 0xbe9   : > { %v2071_v60 = vpop.f32.mrb[42].mxu0 }
 0xbea   : > { %v2076_v5 = vadd.f32 %v2071_v60, %v3907_v35  ;;  %v3197_v62 = vpop.f32.mrb[43].mxu0 }
 0xc80   : > { %v2396_v63 = vpop.f32.mrb[44].mxu0 }
 0xc81   : > { %v2403_v0 = vadd.f32 %v2396_v63, %v2075_v58  ;;  %v3240_v3 = vpop.f32.mrb[45].mxu0 }
 0xc82   : > { %v2399_v8 = vpop.f32.mrb[46].mxu0 }
 0xc83   : > { %v2405_v9 = vadd.f32 %v3546_v1, %v2403_v0  ;;  %v2404_v15 = vadd.f32 %v2399_v8, %v2076_v5  ;;  %v3241_v16 = vpop.f32.mrb[47].mxu0 }
 0xc85   : > { %v2414_v11 = vadd.f32 %v2943_v4, %v2405_v9  ;;  %v2406_v56 = vadd.f32 %v3548_v2, %v2404_v15 }
 0xc87   : > { %2416 = vst.msk [vmem:[#allocation2] sm:$0xff] %vm555_vm0, %v2414_v11  ;;  %v2415_v53 = vadd.f32 %v2943_v4, %v2406_v56  ;;  %v2420_v35 = vsel %vm555_vm0, %v2414_v11, 0.0 }
 0xc88   : > { %2421 = vadd.xlane.f32.xlu1 %v2420_v35 }
 0xc89   : > { %2417 = vst.msk [vmem:[#allocation2 + $0x8] sm:$0xff] %vm555_vm0, %v2415_v53  ;;  %v2423_v19 = vsel %vm555_vm0, %v2415_v53, 0.0 }
 0xc8c   : > { %2424 = vadd.xlane.f32.xlu1 %v2423_v19 }
 0xd15   : > { %v2422_v20 = vpop.xlane.xlu1 %2421 }
 0xd16   : > { %v2426_v55 = vmul.f32 0.03125, %v2422_v20 }
 0xd18   : > { %v2428_v22 = vsub.f32 %v2414_v11, %v2426_v55 }
 0xd19   : > { %v2425_v1 = vpop.xlane.xlu1 %2424 }
 0xd1a   : > { %v2427_v23 = vmul.f32 0.03125, %v2425_v1  ;;  %v2430_v24 = vmul.f32 %v2428_v22, %v2428_v22  ;;  %v2464_v13 = vmul.f32 %v2944_v32, %v2428_v22 }
 0xd1c   : > { %v2429_v25 = vsub.f32 %v2415_v53, %v2427_v23  ;;  %v2432_v2 = vsel %vm555_vm0, %v2430_v24, 0.0 }
 0xd1d   : > { %2433 = vadd.xlane.f32.xlu1 %v2432_v2 }
 0xd1e   : > { %v2431_v26 = vmul.f32 %v2429_v25, %v2429_v25  ;;  %v2465_v37 = vmul.f32 %v2944_v32, %v2429_v25  ;;  %v2567_v25 = vld [vmem:[#allocation4] sm:$0xff] }
 0xd20   : > { %v2435_v29 = vsel %vm555_vm0, %v2431_v26, 0.0  ;;  %v2568_v26 = vld [vmem:[#allocation4 + $0x8] sm:$0xff] }
 0xd21   : > { %2436 = vadd.xlane.f32.xlu1 %v2435_v29 }
 0xdaa   : > { %v2434_v34 = vpop.xlane.xlu1 %2433 }
 0xdab   : > { %v2438_v31 = vmul.f32 0.032258064, %v2434_v34 }
 0xdad   : > { %3405 = vrsqrt.f32 %v2438_v31  ;;  %vm2442_vm9 = vcmp.eq.f32.partialorder %v2438_v31, inf  ;;  %v2445_v10 = vand.u32 2147483648, %v2438_v31  ;;  %vm2444_vm10 = vcmp.eq.f32.partialorder %v2438_v31, 0.0 }
 0xdae   : > { %v2437_v39 = vpop.xlane.xlu1 %2436 }
 0xdaf   : > { %v2439_v17 = vmul.f32 0.032258064, %v2437_v39  ;;  %v2654_v39 = vld [vmem:[#allocation2] sm:$0xff] }
 0xdb1   : > { %3407 = vrsqrt.f32 %v2439_v17  ;;  %vm2449_vm11 = vcmp.eq.f32.partialorder %v2439_v17, inf  ;;  %v2452_v12 = vand.u32 2147483648, %v2439_v17  ;;  %vm2451_vm12 = vcmp.eq.f32.partialorder %v2439_v17, 0.0 }
 0xdb7   : > { %v3406_v33 = vpop.eup %3405 }
 0xdb8   : > { %v2441_v18 = vmul.f32 %v3406_v33, %v2438_v31  ;;  %v2955_v33 = vld [vmem:[%s4082_s11] ss:$0 sm:$0xff] }
 0xdba   : > { %v2443_v21 = vsel %vm2442_vm9, %v2438_v31, %v2441_v18 }
 0xdbb   : > { %v3408_v27 = vpop.eup %3407  ;;  %v2446_v50 = vsel %vm2444_vm10, %v2445_v10, %v2443_v21  ;;  %v2655_v10 = vld [vmem:[#allocation2 + $0x8] sm:$0xff] }
 0xdbc   : > { %v2454_v36 = vadd.f32 1e-06, %v2446_v50  ;;  %v2448_v38 = vmul.f32 %v3408_v27, %v2439_v17 }
 0xdbe   : > { %3409 = vrcp.f32 %v2454_v36  ;;  %v2450_v43 = vsel %vm2449_vm11, %v2439_v17, %v2448_v38 }
 0xdbf   : > { %v2453_v61 = vsel %vm2451_vm12, %v2452_v12, %v2450_v43 }
 0xdc0   : > { %v2455_v42 = vadd.f32 1e-06, %v2453_v61 }
 0xdc2   : > { %3411 = vrcp.f32 %v2455_v42 }
 0xdc8   : > { %v3410_v40 = vpop.eup %3409 }
 0xdc9   : > { %v2466_v57 = vmul.f32 %v3410_v40, %v2464_v13 }
 0xdcb   : > { %v2474_v45 = vadd.f32 %v2945_v44, %v2466_v57 }
 0xdcc   : > { %v3412_v41 = vpop.eup %3411 }
 0xdcd   : > { %v2467_v14 = vmul.f32 %v3412_v41, %v2465_v37 }
 0xdcf   : > { %v2475_v46 = vadd.f32 %v2945_v44, %v2467_v14 }
 0xdd1   : > { %v2476_v28 = vpack.c.bf16 %v2475_v46, %v2474_v45 }
 0xdd3   : > { %2477 = vst.msk [vmem:[#allocation3] sm:$0xff] %vm555_vm0, %v2476_v28 }
 0xdda   : > { %v2480_v47 = vld [vmem:[#allocation3] sm:$0xff] }
 0xddb   : > { %3247 = vmatmul.mubr.msk.bf16.vlgmr.msra.gmra.mrb[56].mxu1 %vm555_vm0, %v2480_v47 }
 0xddc   : > { %3258 = vmatprep.mubr.msk.bf16.mxu1 %vm3443_vm5, %v3442_v6  ;;  %3251 = vmatpush3.bf16.msra.mxu1 %v3361_v7 }
 0xddd   : > { %3252 = vmatprep.subr.bf16.mxu1 %v3442_v6 }
 0xde0   : > { %3253 = vmatpush3.bf16.msra.mxu1 %v3362_v48 }
 0xde1   : > { %3254 = vmatprep.subr.bf16.mxu1 %v3442_v6 }
 0xde4   : > { %3255 = vmatpush3.bf16.msra.mxu1 %v3363_v49 }
 0xde5   : > { %3256 = vmatprep.subr.bf16.mxu1 %v3442_v6 }
 0xde8   : > { %3257 = vmatpush3.bf16.msra.mxu1 %v3364_v52 }
 0xeae   : > { %v2542_v58 = vpop.f32.mrb[56].mxu1 }
 0xeaf   : > { %v2543_v59 = vadd.f32 %v2946_v54, %v2542_v58  ;;  %v3248_v60 = vpop.f32.mrb[57].mxu1 }
 0xeb0   : > { %v2545_v5 = vpop.f32.mrb[58].mxu1 }
 0xeb1   : > { %v2551_v62 = vmul.f32 %v2543_v59, %v2543_v59  ;;  %v2546_v63 = vadd.f32 %v2946_v54, %v2545_v5  ;;  %v3249_v0 = vpop.f32.mrb[59].mxu1  ;;  %v2549_v20 = vmul.f32 0.5, %v2543_v59 }
 0xeb3   : > { %v2553_v3 = vmul.f32 %v2551_v62, %v2543_v59  ;;  %v2552_v4 = vmul.f32 %v2546_v63, %v2546_v63  ;;  %v2550_v55 = vmul.f32 0.5, %v2546_v63 }
 0xeb5   : > { %v2555_v8 = vmul.f32 0.044715, %v2553_v3  ;;  %v2554_v6 = vmul.f32 %v2552_v4, %v2546_v63 }
 0xeb7   : > { %v2557_v9 = vadd.f32 %v2555_v8, %v2543_v59  ;;  %v2556_v15 = vmul.f32 0.044715, %v2554_v6 }
 0xeb9   : > { %v2559_v16 = vmul.f32 0.7978846, %v2557_v9  ;;  %v2558_v11 = vadd.f32 %v2556_v15, %v2546_v63 }
 0xebb   : > { %3413 = vtanh.f32 %v2559_v16  ;;  %v2560_v56 = vmul.f32 0.7978846, %v2558_v11 }
 0xebd   : > { %3415 = vtanh.f32 %v2560_v56 }
 0xec5   : > { %v3414_v53 = vpop.eup %3413 }
 0xec6   : > { %v2563_v35 = vadd.f32 1.0, %v3414_v53 }
 0xec7   : > { %v3416_v19 = vpop.eup %3415 }
 0xec8   : > { %v2564_v22 = vadd.f32 1.0, %v3416_v19  ;;  %v2565_v1 = vmul.f32 %v2563_v35, %v2549_v20 }
 0xeca   : > { %v2566_v23 = vmul.f32 %v2564_v22, %v2550_v55 }
 0xecc   : > { %v2569_v24 = vpack.c.bf16 %v2566_v23, %v2565_v1 }
 0xece   : > { %3259 = vmatmul.mubr.msk.bf16.vlgmr.msra.gmra.mrb[60].mxu1 %vm2602_vm13, %v2569_v24 }
 0xfa1   : > { %v2640_v2 = vpop.f32.mrb[60].mxu1 }
 0xfa2   : > { %v2647_v29 = vadd.f32 %v2640_v2, %v2567_v25  ;;  %v3260_v51 = vpop.f32.mrb[61].mxu1 }
 0xfa3   : > { %v2643_v30 = vpop.f32.mrb[62].mxu1 }
 0xfa4   : > { %2649 = vst.msk [vmem:[#allocation4] sm:$0xff] %vm555_vm0, %v2647_v29  ;;  %v2648_v34 = vadd.f32 %v2643_v30, %v2568_v26  ;;  %v3261_v31 = vpop.f32.mrb[63].mxu1 }
 0xfa6   : > { %2650 = vst.msk [vmem:[#allocation4 + $0x8] sm:$0xff] %vm555_vm0, %v2648_v34 }
 0xfab   : > { %v2656_v17 = vld [vmem:[#allocation4] sm:$0xff] }
 0xfac   : > { %v2658_v18 = vadd.f32 %v2656_v17, %v2654_v39 }
 0xfad   : > { %v2657_v21 = vld [vmem:[#allocation4 + $0x8] sm:$0xff] }
 0xfae   : > { %v2667_v27 = vadd.f32 %v2955_v33, %v2658_v18  ;;  %v2659_v50 = vadd.f32 %v2657_v21, %v2655_v10 }
 0xfb0   : > { %v2984_v36 = vpack.c.bf16 %v2667_v27, %v2667_v27  ;;  %v2668_v38 = vadd.f32 %v2955_v33, %v2659_v50 }
 0xfb2   : > { %2678 = vst.msk [vmem:[%s534_s25] sm:$0xf] %vm2677_vm14, %v2984_v36  ;;  %v2985_v12 = vpack.c.bf16 %v2668_v38, %v2668_v38 }
 0xfb4   : > { %2679 = vst.msk [vmem:[%s534_s25 + $0x4] sm:$0xf] %vm2677_vm14, %v2985_v12 }
 0xfb5 PF: > { %s24_s15 = sadd.s32 1, %s3439_s15   ;;  %s4088_s29 = smov %s3435_s30 }
 0xfb6   : > { %p21_p5 = scmp.ge.s32.totalorder %s24_s15, 6   ;;  %s4089_s30 = smov %s4091_s16 }
 0xfb8   :  { %23 = sbr.rel (!%p21_p5) target bundleno = 2 (0x2), region = 126 }

</bundles_post_ra>
